<compile_context>
chip_gen: v6e
topology: v6e:2x2x1
jax: 0.10.0
libtpu: 0.0.40
codegen_flags: <defaults>
</compile_context>

<pallas_src>
import functools

import jax
import jax.numpy as jnp
from jax.experimental import pallas as pl
from jax.experimental.pallas import tpu as pltpu

_DILATIONS = (1, 6, 12, 18)
_PAD = 18          # max dilation -> shared zero padding for all ASPP branches


# ---------------------------------------------------------------------------
# Fused kernel (one grid step == one batch element)
# ---------------------------------------------------------------------------

def _residual_block_kernel(x_ref,                        # (4*Cin, Lp4) bf16
                           wA_ref, bA_ref,               # ASPP  (C4, 4*3*Cin) bf16, (C4,1) f32
                           w1_ref, b1_ref,               # conv1 (5, C4, C4) bf16,   (C4,1) f32
                           w2_ref, b2_ref,               # conv2 (3, C4, C4) bf16,   (C4,1) f32
                           cw1_ref, cb1_ref,             # CBAM MLP (Ch,C4),(Ch,1) f32
                           cw2_ref, cb2_ref,             #          (C4,Ch),(C4,1) f32
                           wsp_ref,                      # VMEM (2, 7) f32 spatial taps
                           bsp_ref,                      # SMEM (1,)  f32 spatial bias
                           o_ref,                        # (C4, Lo) f32
                           col_ref, pad_ref, idn_ref, stat_ref, sp_ref,
                           *, Lo, Cin):
    C4 = o_ref.shape[0]
    K = 3
    blk = K * Cin                                        # im2col rows / branch

    # ---- ASPP (conv + folded BN) fused with MaxPool1d(4) + ReLU -------------
    # Phase p picks pooled-output positions 4*j + p.  All 4 phases are packed
    # along lanes of ONE bf16 RHS -> one wide MXU dot; pool == max over the
    # 4 lane slices (ReLU and the per-channel bias commute with max).
    for p in range(4):
        for br, d in enumerate(_DILATIONS):
            for k in range(K):
                off = p + _PAD + (k - 1) * d             # offset in padded x
                q, r = off // 4, off % 4
                col_ref[br * blk + k * Cin: br * blk + (k + 1) * Cin,
                        p * Lo:(p + 1) * Lo] = x_ref[r * Cin:(r + 1) * Cin,
                                                     q:q + Lo]
    z = jnp.dot(wA_ref[...], col_ref[...],
                preferred_element_type=jnp.float32)      # (C4, 4*Lo)
    zmax = jnp.maximum(jnp.maximum(z[:, 0 * Lo:1 * Lo], z[:, 1 * Lo:2 * Lo]),
                       jnp.maximum(z[:, 2 * Lo:3 * Lo], z[:, 3 * Lo:4 * Lo]))
    pooled = jnp.maximum(zmax + bA_ref[...], 0.0)        # (C4, Lo) f32
    idn_ref[...] = pooled                                # residual identity

    # ---- conv_block1 (k=5, pad=2) + BN1 + ReLU: per-tap shallow dots --------
    # Only the edge columns are zeroed (they stay zero across conv1 AND conv2).
    pad_ref[:, 0:2] = jnp.zeros((C4, 2), pad_ref.dtype)
    pad_ref[:, 2 + Lo:4 + Lo] = jnp.zeros((C4, 2), pad_ref.dtype)
    pad_ref[:, 2:2 + Lo] = pooled.astype(pad_ref.dtype)
    acc = jnp.dot(w1_ref[0], pad_ref[:, 0:Lo],
                  preferred_element_type=jnp.float32)
    for k in range(1, 5):
        acc = acc + jnp.dot(w1_ref[k], pad_ref[:, k:k + Lo],
                            preferred_element_type=jnp.float32)
    out1 = jnp.maximum(acc + b1_ref[...], 0.0)           # (C4, Lo)

    # ---- conv_block2 (k=3, pad=1) + BN2 + ReLU ------------------------------
    pad_ref[:, 2:2 + Lo] = out1.astype(pad_ref.dtype)    # edges are still zero
    acc = jnp.dot(w2_ref[0], pad_ref[:, 1:1 + Lo],
                  preferred_element_type=jnp.float32)
    for k in range(1, 3):
        acc = acc + jnp.dot(w2_ref[k], pad_ref[:, 1 + k:1 + k + Lo],
                            preferred_element_type=jnp.float32)
    out2 = jnp.maximum(acc + b2_ref[...], 0.0)           # (C4, Lo)

    # ---- CBAM channel attention (batched avg/max MLP) -----------------------
    stat_ref[:, 0:1] = jnp.mean(out2, axis=-1, keepdims=True)
    stat_ref[:, 1:2] = jnp.max(out2, axis=-1, keepdims=True)
    h = jnp.maximum(
        jnp.dot(cw1_ref[...], stat_ref[...],
                preferred_element_type=jnp.float32) + cb1_ref[...], 0.0)
    att = jnp.dot(cw2_ref[...], h,
                  preferred_element_type=jnp.float32) + cb2_ref[...]  # (C4,2)
    ca = jax.nn.sigmoid(att[:, 0:1] + att[:, 1:2])       # (C4, 1)
    xc = out2 * ca                                       # (C4, Lo)

    # ---- CBAM spatial attention: conv1d(2->1, k=7, pad=3), sublane-dense ----
    sp_ref[:, 0:3] = jnp.zeros((2, 3), jnp.float32)
    sp_ref[:, 3 + Lo:6 + Lo] = jnp.zeros((2, 3), jnp.float32)
    sp_ref[0:1, 3:3 + Lo] = jnp.mean(xc, axis=0, keepdims=True)
    sp_ref[1:2, 3:3 + Lo] = jnp.max(xc, axis=0, keepdims=True)
    macc = wsp_ref[:, 0:1] * sp_ref[:, 0:Lo]             # (2, Lo) MACs
    for k in range(1, 7):
        macc = macc + wsp_ref[:, k:k + 1] * sp_ref[:, k:k + Lo]
    logit = macc[0:1, :] + macc[1:2, :] + bsp_ref[0]     # (1, Lo)
    sa = jax.nn.sigmoid(logit)

    # ---- CBAM output + residual add -----------------------------------------
    o_ref[...] = xc * sa + idn_ref[...]


# ---------------------------------------------------------------------------
# Wrapper (plain-JAX glue around one pallas_call)
# ---------------------------------------------------------------------------

def residual_block_forward(x, params):
    N, Cin, L = x.shape
    assert L % 4 == 0, "MaxPool1d(4) requires L divisible by 4 here"
    Lo = L // 4
    C4 = params["b_aspp"].shape[0]
    Ch = params["cw1"].shape[0]

    # Shared zero padding (pad = 18 covers every dilation), then phase-split
    # with stride 4 so the maxpool can be fused into the ASPP matmul.  The
    # phase dim is merged into sublanes ((N, 4*Cin, Lp4)) and the activation
    # path is bf16 from the source (halves the input DMA bytes).
    xp = jnp.pad(x, ((0, 0), (0, 0), (_PAD, _PAD)))              # (N,Cin,L+36)
    Lp4 = (L + 2 * _PAD) // 4
    xph = jnp.concatenate([xp[:, :, r::4] for r in range(4)],
                          axis=1).astype(jnp.bfloat16)           # (N,4*Cin,Lp4)

    kern = functools.partial(_residual_block_kernel, Lo=Lo, Cin=Cin)
    smem = pltpu.MemorySpace.SMEM

    return pl.pallas_call(
        kern,
        out_shape=jax.ShapeDtypeStruct((N, C4, Lo), jnp.float32),
        grid=(N,),
        in_specs=[
            pl.BlockSpec((None, 4 * Cin, Lp4), lambda n: (n, 0, 0)),
            pl.BlockSpec((C4, 4 * 3 * Cin), lambda n: (0, 0)),
            pl.BlockSpec((C4, 1), lambda n: (0, 0)),
            pl.BlockSpec((5, C4, C4), lambda n: (0, 0, 0)),
            pl.BlockSpec((C4, 1), lambda n: (0, 0)),
            pl.BlockSpec((3, C4, C4), lambda n: (0, 0, 0)),
            pl.BlockSpec((C4, 1), lambda n: (0, 0)),
            pl.BlockSpec((Ch, C4), lambda n: (0, 0)),
            pl.BlockSpec((Ch, 1), lambda n: (0, 0)),
            pl.BlockSpec((C4, Ch), lambda n: (0, 0)),
            pl.BlockSpec((C4, 1), lambda n: (0, 0)),
            pl.BlockSpec((2, 7), lambda n: (0, 0)),      # wsp taps (VMEM)
            pl.BlockSpec(memory_space=smem),             # bsp (1,) scalar
        ],
        out_specs=pl.BlockSpec((None, C4, Lo), lambda n: (n, 0, 0)),
        scratch_shapes=[
            pltpu.VMEM((4 * 3 * Cin, 4 * Lo), jnp.bfloat16),  # phase-packed im2col
            pltpu.VMEM((C4, Lo + 4), jnp.bfloat16),           # zero-padded feature
            pltpu.VMEM((C4, Lo), jnp.float32),                # residual identity
            pltpu.VMEM((C4, 2), jnp.float32),                 # (avg,max) channel stats
            pltpu.VMEM((2, Lo + 6), jnp.float32),             # padded spatial stats
        ],
        compiler_params=pltpu.CompilerParams(
            dimension_semantics=("parallel",)),
    )(xph,
      params["w_aspp"], params["b_aspp"],
      params["w1t"], params["b1c"],
      params["w2t"], params["b2c"],
      params["cw1"], params["cb1"], params["cw2"], params["cb2"],
      params["wsp"], params["bsp"])


# ---------------------------------------------------------------------------
# Parameter construction (deterministic, synthetic; BN folded)
# ---------------------------------------------------------------------------

def init_params(key, in_channels, out_channels):
    keys = iter(jax.random.split(key, 64))
    Cin, C4 = in_channels, out_channels * 4

    def conv_init(cout, cin, k):
        bound = 1.0 / (cin * k) ** 0.5
        w = jax.random.uniform(next(keys), (cout, cin, k), jnp.float32,
                               -bound, bound)
        b = jax.random.uniform(next(keys), (cout,), jnp.float32, -bound, bound)
        return w, b

    def bn_init(c):
        gamma = 1.0 + 0.1 * jax.random.normal(next(keys), (c,), jnp.float32)
        beta = 0.1 * jax.random.normal(next(keys), (c,), jnp.float32)
        mean = 0.1 * jax.random.normal(next(keys), (c,), jnp.float32)
        var = 1.0 + 0.1 * jnp.abs(jax.random.normal(next(keys), (c,),
                                                    jnp.float32))
        return gamma, beta, mean, var

    def fold(w, b, bn, eps=1e-5):
        gamma, beta, mean, var = bn
        s = gamma / jnp.sqrt(var + eps)
        return w * s[:, None, None], (b - mean) * s + beta

    def to_im2col(wf):                        # (Cout, Cin, K) -> (Cout, K*Cin)
        cout = wf.shape[0]
        return jnp.transpose(wf, (0, 2, 1)).reshape(cout, -1)

    # ASPP: block-diagonal im2col weight (C4, 4*3*Cin), folded bias (C4, 1)
    wA = jnp.zeros((C4, 4 * 3 * Cin), jnp.float32)
    bA = []
    for br in range(4):
        w, b = conv_init(out_channels, Cin, 3)
        wf, bf = fold(w, b, bn_init(out_channels))
        wA = wA.at[br * out_channels:(br + 1) * out_channels,
                   br * 3 * Cin:(br + 1) * 3 * Cin].set(to_im2col(wf))
        bA.append(bf)
    bA = jnp.concatenate(bA).reshape(C4, 1)

    # conv_block1 (k=5) + BN1, conv_block2 (k=3) + BN2 — per-tap weight stacks
    w, b = conv_init(C4, C4, 5)
    wf, bf = fold(w, b, bn_init(C4))
    w1t, b1c = jnp.transpose(wf, (2, 0, 1)), bf.reshape(C4, 1)   # (5, C4, C4)
    w, b = conv_init(C4, C4, 3)
    wf, bf = fold(w, b, bn_init(C4))
    w2t, b2c = jnp.transpose(wf, (2, 0, 1)), bf.reshape(C4, 1)   # (3, C4, C4)

    # CBAM: channel MLP (reduction 4) + spatial conv (k=7, pad=3)
    Ch = max(C4 // 4, 1)
    cw1 = 0.3 * jax.random.normal(next(keys), (Ch, C4), jnp.float32)
    cb1 = 0.1 * jax.random.normal(next(keys), (Ch, 1), jnp.float32)
    cw2 = 0.3 * jax.random.normal(next(keys), (C4, Ch), jnp.float32)
    cb2 = 0.1 * jax.random.normal(next(keys), (C4, 1), jnp.float32)
    wsp = 0.3 * jax.random.normal(next(keys), (2, 7), jnp.float32)
    bsp = 0.1 * jax.random.normal(next(keys), (1,), jnp.float32)

    return {
        # bf16 weights for the MXU (accumulation stays f32 in-kernel)
        "w_aspp": wA.astype(jnp.bfloat16), "b_aspp": bA,
        "w1t": w1t.astype(jnp.bfloat16), "b1c": b1c,
        "w2t": w2t.astype(jnp.bfloat16), "b2c": b2c,
        "cw1": cw1, "cb1": cb1, "cw2": cw2, "cb2": cb2,
        "wsp": wsp, "bsp": bsp,
    }


if __name__ == "__main__":
    key = jax.random.PRNGKey(0)
    pkey, xkey = jax.random.split(key)

    in_channels, out_channels = 4, 4
    N, L = 2, 16                                   # x: (N, C_in, L) = (2, 4, 16)

    x = jax.random.normal(xkey, (N, in_channels, L), jnp.float32)
    params = init_params(pkey, in_channels, out_channels)

    out = jax.block_until_ready(residual_block_forward(x, params))

    assert out.shape == (N, out_channels * 4, L // 4), out.shape
    assert bool(jnp.all(jnp.isfinite(out)))
    print("KERNEL_OK")
</pallas_src>

<mosaic_0001>
module attributes {stable_mosaic.version = 11 : i64} {
  func.func @_residual_block_kernel(%arg0: i32, %arg1: memref<1x16x13xbf16, #tpu.memory_space<vmem>>, %arg2: memref<16x48xbf16, #tpu.memory_space<vmem>>, %arg3: memref<16x1xf32, #tpu.memory_space<vmem>>, %arg4: memref<5x16x16xbf16, #tpu.memory_space<vmem>>, %arg5: memref<16x1xf32, #tpu.memory_space<vmem>>, %arg6: memref<3x16x16xbf16, #tpu.memory_space<vmem>>, %arg7: memref<16x1xf32, #tpu.memory_space<vmem>>, %arg8: memref<4x16xf32, #tpu.memory_space<vmem>>, %arg9: memref<4x1xf32, #tpu.memory_space<vmem>>, %arg10: memref<16x4xf32, #tpu.memory_space<vmem>>, %arg11: memref<16x1xf32, #tpu.memory_space<vmem>>, %arg12: memref<2x7xf32, #tpu.memory_space<vmem>>, %arg13: memref<1xf32, #tpu.memory_space<smem>>, %arg14: memref<1x16x4xf32, #tpu.memory_space<vmem>>, %arg15: memref<48x16xbf16, #tpu.memory_space<vmem>>, %arg16: memref<16x8xbf16, #tpu.memory_space<vmem>>, %arg17: memref<16x4xf32, #tpu.memory_space<vmem>>, %arg18: memref<16x2xf32, #tpu.memory_space<vmem>>, %arg19: memref<2x10xf32, #tpu.memory_space<vmem>>) attributes {dimension_semantics = [#tpu.dimension_semantics<parallel>], iteration_bounds = array<i64: 2>, scalar_prefetch = 0 : i64, scratch_operands = 5 : i64, tpu.core_type = #tpu.core_type<tc>, window_params = [{transform_indices = @transform_0, window_bounds = array<i64: 1, 16, 13>}, {pipeline_mode = #tpu.pipeline_mode<synchronous>, transform_indices = @transform_1, window_bounds = array<i64: 16, 48>}, {pipeline_mode = #tpu.pipeline_mode<synchronous>, transform_indices = @transform_2, window_bounds = array<i64: 16, 1>}, {pipeline_mode = #tpu.pipeline_mode<synchronous>, transform_indices = @transform_3, window_bounds = array<i64: 5, 16, 16>}, {pipeline_mode = #tpu.pipeline_mode<synchronous>, transform_indices = @transform_4, window_bounds = array<i64: 16, 1>}, {pipeline_mode = #tpu.pipeline_mode<synchronous>, transform_indices = @transform_5, window_bounds = array<i64: 3, 16, 16>}, {pipeline_mode = #tpu.pipeline_mode<synchronous>, transform_indices = @transform_6, window_bounds = array<i64: 16, 1>}, {pipeline_mode = #tpu.pipeline_mode<synchronous>, transform_indices = @transform_7, window_bounds = array<i64: 4, 16>}, {pipeline_mode = #tpu.pipeline_mode<synchronous>, transform_indices = @transform_8, window_bounds = array<i64: 4, 1>}, {pipeline_mode = #tpu.pipeline_mode<synchronous>, transform_indices = @transform_9, window_bounds = array<i64: 16, 4>}, {pipeline_mode = #tpu.pipeline_mode<synchronous>, transform_indices = @transform_10, window_bounds = array<i64: 16, 1>}, {pipeline_mode = #tpu.pipeline_mode<synchronous>, transform_indices = @transform_11, window_bounds = array<i64: 2, 7>}, {transform_indices = @transform_12, window_bounds = array<i64: 1>}, {transform_indices = @transform_13, window_bounds = array<i64: 1, 16, 4>}]} {
    %c0 = arith.constant 0 : index
    %c4 = arith.constant 4 : index
    %c4_0 = arith.constant 4 : index
    %0 = vector.load %arg1[%c0, %c4, %c4_0] : memref<1x16x13xbf16, #tpu.memory_space<vmem>>, vector<1x4x4xbf16>
    %1 = vector.shape_cast %0 : vector<1x4x4xbf16> to vector<4x4xbf16>
    %c0_1 = arith.constant 0 : index
    %c0_2 = arith.constant 0 : index
    %2 = vector.load %arg15[%c0_1, %c0_2] : memref<48x16xbf16, #tpu.memory_space<vmem>>, vector<4x4xbf16>
    tpu.vector_store %arg15[%c0_1, %c0_2], %1 {strides = array<i32>} : memref<48x16xbf16, #tpu.memory_space<vmem>>, vector<4x4xbf16>,
    %c0_3 = arith.constant 0 : index
    %c8 = arith.constant 8 : index
    %c4_4 = arith.constant 4 : index
    %3 = vector.load %arg1[%c0_3, %c8, %c4_4] : memref<1x16x13xbf16, #tpu.memory_space<vmem>>, vector<1x4x4xbf16>
    %4 = vector.shape_cast %3 : vector<1x4x4xbf16> to vector<4x4xbf16>
    %c4_5 = arith.constant 4 : index
    %c0_6 = arith.constant 0 : index
    %5 = vector.load %arg15[%c4_5, %c0_6] : memref<48x16xbf16, #tpu.memory_space<vmem>>, vector<4x4xbf16>
    tpu.vector_store %arg15[%c4_5, %c0_6], %4 {strides = array<i32>} : memref<48x16xbf16, #tpu.memory_space<vmem>>, vector<4x4xbf16>,
    %c0_7 = arith.constant 0 : index
    %c12 = arith.constant 12 : index
    %c4_8 = arith.constant 4 : index
    %6 = vector.load %arg1[%c0_7, %c12, %c4_8] : memref<1x16x13xbf16, #tpu.memory_space<vmem>>, vector<1x4x4xbf16>
    %7 = vector.shape_cast %6 : vector<1x4x4xbf16> to vector<4x4xbf16>
    %c8_9 = arith.constant 8 : index
    %c0_10 = arith.constant 0 : index
    %8 = vector.load %arg15[%c8_9, %c0_10] : memref<48x16xbf16, #tpu.memory_space<vmem>>, vector<4x4xbf16>
    tpu.vector_store %arg15[%c8_9, %c0_10], %7 {strides = array<i32>} : memref<48x16xbf16, #tpu.memory_space<vmem>>, vector<4x4xbf16>,
    %c0_11 = arith.constant 0 : index
    %c0_12 = arith.constant 0 : index
    %c3 = arith.constant 3 : index
    %9 = vector.load %arg1[%c0_11, %c0_12, %c3] : memref<1x16x13xbf16, #tpu.memory_space<vmem>>, vector<1x4x4xbf16>
    %10 = vector.shape_cast %9 : vector<1x4x4xbf16> to vector<4x4xbf16>
    %c12_13 = arith.constant 12 : index
    %c0_14 = arith.constant 0 : index
    %11 = vector.load %arg15[%c12_13, %c0_14] : memref<48x16xbf16, #tpu.memory_space<vmem>>, vector<4x4xbf16>
    tpu.vector_store %arg15[%c12_13, %c0_14], %10 {strides = array<i32>} : memref<48x16xbf16, #tpu.memory_space<vmem>>, vector<4x4xbf16>,
    %c0_15 = arith.constant 0 : index
    %c8_16 = arith.constant 8 : index
    %c4_17 = arith.constant 4 : index
    %12 = vector.load %arg1[%c0_15, %c8_16, %c4_17] : memref<1x16x13xbf16, #tpu.memory_space<vmem>>, vector<1x4x4xbf16>
    %13 = vector.shape_cast %12 : vector<1x4x4xbf16> to vector<4x4xbf16>
    %c16 = arith.constant 16 : index
    %c0_18 = arith.constant 0 : index
    %14 = vector.load %arg15[%c16, %c0_18] : memref<48x16xbf16, #tpu.memory_space<vmem>>, vector<4x4xbf16>
    tpu.vector_store %arg15[%c16, %c0_18], %13 {strides = array<i32>} : memref<48x16xbf16, #tpu.memory_space<vmem>>, vector<4x4xbf16>,
    %c0_19 = arith.constant 0 : index
    %c0_20 = arith.constant 0 : index
    %c6 = arith.constant 6 : index
    %15 = vector.load %arg1[%c0_19, %c0_20, %c6] : memref<1x16x13xbf16, #tpu.memory_space<vmem>>, vector<1x4x4xbf16>
    %16 = vector.shape_cast %15 : vector<1x4x4xbf16> to vector<4x4xbf16>
    %c20 = arith.constant 20 : index
    %c0_21 = arith.constant 0 : index
    %17 = vector.load %arg15[%c20, %c0_21] : memref<48x16xbf16, #tpu.memory_space<vmem>>, vector<4x4xbf16>
    tpu.vector_store %arg15[%c20, %c0_21], %16 {strides = array<i32>} : memref<48x16xbf16, #tpu.memory_space<vmem>>, vector<4x4xbf16>,
    %c0_22 = arith.constant 0 : index
    %c8_23 = arith.constant 8 : index
    %c1 = arith.constant 1 : index
    %18 = vector.load %arg1[%c0_22, %c8_23, %c1] : memref<1x16x13xbf16, #tpu.memory_space<vmem>>, vector<1x4x4xbf16>
    %19 = vector.shape_cast %18 : vector<1x4x4xbf16> to vector<4x4xbf16>
    %c24 = arith.constant 24 : index
    %c0_24 = arith.constant 0 : index
    %20 = vector.load %arg15[%c24, %c0_24] : memref<48x16xbf16, #tpu.memory_space<vmem>>, vector<4x4xbf16>
    tpu.vector_store %arg15[%c24, %c0_24], %19 {strides = array<i32>} : memref<48x16xbf16, #tpu.memory_space<vmem>>, vector<4x4xbf16>,
    %c0_25 = arith.constant 0 : index
    %c8_26 = arith.constant 8 : index
    %c4_27 = arith.constant 4 : index
    %21 = vector.load %arg1[%c0_25, %c8_26, %c4_27] : memref<1x16x13xbf16, #tpu.memory_space<vmem>>, vector<1x4x4xbf16>
    %22 = vector.shape_cast %21 : vector<1x4x4xbf16> to vector<4x4xbf16>
    %c28 = arith.constant 28 : index
    %c0_28 = arith.constant 0 : index
    %23 = vector.load %arg15[%c28, %c0_28] : memref<48x16xbf16, #tpu.memory_space<vmem>>, vector<4x4xbf16>
    tpu.vector_store %arg15[%c28, %c0_28], %22 {strides = array<i32>} : memref<48x16xbf16, #tpu.memory_space<vmem>>, vector<4x4xbf16>,
    %c0_29 = arith.constant 0 : index
    %c8_30 = arith.constant 8 : index
    %c7 = arith.constant 7 : index
    %24 = vector.load %arg1[%c0_29, %c8_30, %c7] : memref<1x16x13xbf16, #tpu.memory_space<vmem>>, vector<1x4x4xbf16>
    %25 = vector.shape_cast %24 : vector<1x4x4xbf16> to vector<4x4xbf16>
    %c32 = arith.constant 32 : index
    %c0_31 = arith.constant 0 : index
    %26 = vector.load %arg15[%c32, %c0_31] : memref<48x16xbf16, #tpu.memory_space<vmem>>, vector<4x4xbf16>
    tpu.vector_store %arg15[%c32, %c0_31], %25 {strides = array<i32>} : memref<48x16xbf16, #tpu.memory_space<vmem>>, vector<4x4xbf16>,
    %c0_32 = arith.constant 0 : index
    %c0_33 = arith.constant 0 : index
    %c0_34 = arith.constant 0 : index
    %27 = vector.load %arg1[%c0_32, %c0_33, %c0_34] : memref<1x16x13xbf16, #tpu.memory_space<vmem>>, vector<1x4x4xbf16>
    %28 = vector.shape_cast %27 : vector<1x4x4xbf16> to vector<4x4xbf16>
    %c36 = arith.constant 36 : index
    %c0_35 = arith.constant 0 : index
    %29 = vector.load %arg15[%c36, %c0_35] : memref<48x16xbf16, #tpu.memory_space<vmem>>, vector<4x4xbf16>
    tpu.vector_store %arg15[%c36, %c0_35], %28 {strides = array<i32>} : memref<48x16xbf16, #tpu.memory_space<vmem>>, vector<4x4xbf16>,
    %c0_36 = arith.constant 0 : index
    %c8_37 = arith.constant 8 : index
    %c4_38 = arith.constant 4 : index
    %30 = vector.load %arg1[%c0_36, %c8_37, %c4_38] : memref<1x16x13xbf16, #tpu.memory_space<vmem>>, vector<1x4x4xbf16>
    %31 = vector.shape_cast %30 : vector<1x4x4xbf16> to vector<4x4xbf16>
    %c40 = arith.constant 40 : index
    %c0_39 = arith.constant 0 : index
    %32 = vector.load %arg15[%c40, %c0_39] : memref<48x16xbf16, #tpu.memory_space<vmem>>, vector<4x4xbf16>
    tpu.vector_store %arg15[%c40, %c0_39], %31 {strides = array<i32>} : memref<48x16xbf16, #tpu.memory_space<vmem>>, vector<4x4xbf16>,
    %c0_40 = arith.constant 0 : index
    %c0_41 = arith.constant 0 : index
    %c9 = arith.constant 9 : index
    %33 = vector.load %arg1[%c0_40, %c0_41, %c9] : memref<1x16x13xbf16, #tpu.memory_space<vmem>>, vector<1x4x4xbf16>
    %34 = vector.shape_cast %33 : vector<1x4x4xbf16> to vector<4x4xbf16>
    %c44 = arith.constant 44 : index
    %c0_42 = arith.constant 0 : index
    %35 = vector.load %arg15[%c44, %c0_42] : memref<48x16xbf16, #tpu.memory_space<vmem>>, vector<4x4xbf16>
    tpu.vector_store %arg15[%c44, %c0_42], %34 {strides = array<i32>} : memref<48x16xbf16, #tpu.memory_space<vmem>>, vector<4x4xbf16>,
    %c0_43 = arith.constant 0 : index
    %c8_44 = arith.constant 8 : index
    %c4_45 = arith.constant 4 : index
    %36 = vector.load %arg1[%c0_43, %c8_44, %c4_45] : memref<1x16x13xbf16, #tpu.memory_space<vmem>>, vector<1x4x4xbf16>
    %37 = vector.shape_cast %36 : vector<1x4x4xbf16> to vector<4x4xbf16>
    %c0_46 = arith.constant 0 : index
    %c4_47 = arith.constant 4 : index
    %38 = vector.load %arg15[%c0_46, %c4_47] : memref<48x16xbf16, #tpu.memory_space<vmem>>, vector<4x4xbf16>
    tpu.vector_store %arg15[%c0_46, %c4_47], %37 {strides = array<i32>} : memref<48x16xbf16, #tpu.memory_space<vmem>>, vector<4x4xbf16>,
    %c0_48 = arith.constant 0 : index
    %c12_49 = arith.constant 12 : index
    %c4_50 = arith.constant 4 : index
    %39 = vector.load %arg1[%c0_48, %c12_49, %c4_50] : memref<1x16x13xbf16, #tpu.memory_space<vmem>>, vector<1x4x4xbf16>
    %40 = vector.shape_cast %39 : vector<1x4x4xbf16> to vector<4x4xbf16>
    %c4_51 = arith.constant 4 : index
    %c4_52 = arith.constant 4 : index
    %41 = vector.load %arg15[%c4_51, %c4_52] : memref<48x16xbf16, #tpu.memory_space<vmem>>, vector<4x4xbf16>
    tpu.vector_store %arg15[%c4_51, %c4_52], %40 {strides = array<i32>} : memref<48x16xbf16, #tpu.memory_space<vmem>>, vector<4x4xbf16>,
    %c0_53 = arith.constant 0 : index
    %c0_54 = arith.constant 0 : index
    %c5 = arith.constant 5 : index
    %42 = vector.load %arg1[%c0_53, %c0_54, %c5] : memref<1x16x13xbf16, #tpu.memory_space<vmem>>, vector<1x4x4xbf16>
    %43 = vector.shape_cast %42 : vector<1x4x4xbf16> to vector<4x4xbf16>
    %c8_55 = arith.constant 8 : index
    %c4_56 = arith.constant 4 : index
    %44 = vector.load %arg15[%c8_55, %c4_56] : memref<48x16xbf16, #tpu.memory_space<vmem>>, vector<4x4xbf16>
    tpu.vector_store %arg15[%c8_55, %c4_56], %43 {strides = array<i32>} : memref<48x16xbf16, #tpu.memory_space<vmem>>, vector<4x4xbf16>,
    %c0_57 = arith.constant 0 : index
    %c4_58 = arith.constant 4 : index
    %c3_59 = arith.constant 3 : index
    %45 = vector.load %arg1[%c0_57, %c4_58, %c3_59] : memref<1x16x13xbf16, #tpu.memory_space<vmem>>, vector<1x4x4xbf16>
    %46 = vector.shape_cast %45 : vector<1x4x4xbf16> to vector<4x4xbf16>
    %c12_60 = arith.constant 12 : index
    %c4_61 = arith.constant 4 : index
    %47 = vector.load %arg15[%c12_60, %c4_61] : memref<48x16xbf16, #tpu.memory_space<vmem>>, vector<4x4xbf16>
    tpu.vector_store %arg15[%c12_60, %c4_61], %46 {strides = array<i32>} : memref<48x16xbf16, #tpu.memory_space<vmem>>, vector<4x4xbf16>,
    %c0_62 = arith.constant 0 : index
    %c12_63 = arith.constant 12 : index
    %c4_64 = arith.constant 4 : index
    %48 = vector.load %arg1[%c0_62, %c12_63, %c4_64] : memref<1x16x13xbf16, #tpu.memory_space<vmem>>, vector<1x4x4xbf16>
    %49 = vector.shape_cast %48 : vector<1x4x4xbf16> to vector<4x4xbf16>
    %c16_65 = arith.constant 16 : index
    %c4_66 = arith.constant 4 : index
    %50 = vector.load %arg15[%c16_65, %c4_66] : memref<48x16xbf16, #tpu.memory_space<vmem>>, vector<4x4xbf16>
    tpu.vector_store %arg15[%c16_65, %c4_66], %49 {strides = array<i32>} : memref<48x16xbf16, #tpu.memory_space<vmem>>, vector<4x4xbf16>,
    %c0_67 = arith.constant 0 : index
    %c4_68 = arith.constant 4 : index
    %c6_69 = arith.constant 6 : index
    %51 = vector.load %arg1[%c0_67, %c4_68, %c6_69] : memref<1x16x13xbf16, #tpu.memory_space<vmem>>, vector<1x4x4xbf16>
    %52 = vector.shape_cast %51 : vector<1x4x4xbf16> to vector<4x4xbf16>
    %c20_70 = arith.constant 20 : index
    %c4_71 = arith.constant 4 : index
    %53 = vector.load %arg15[%c20_70, %c4_71] : memref<48x16xbf16, #tpu.memory_space<vmem>>, vector<4x4xbf16>
    tpu.vector_store %arg15[%c20_70, %c4_71], %52 {strides = array<i32>} : memref<48x16xbf16, #tpu.memory_space<vmem>>, vector<4x4xbf16>,
    %c0_72 = arith.constant 0 : index
    %c12_73 = arith.constant 12 : index
    %c1_74 = arith.constant 1 : index
    %54 = vector.load %arg1[%c0_72, %c12_73, %c1_74] : memref<1x16x13xbf16, #tpu.memory_space<vmem>>, vector<1x4x4xbf16>
    %55 = vector.shape_cast %54 : vector<1x4x4xbf16> to vector<4x4xbf16>
    %c24_75 = arith.constant 24 : index
    %c4_76 = arith.constant 4 : index
    %56 = vector.load %arg15[%c24_75, %c4_76] : memref<48x16xbf16, #tpu.memory_space<vmem>>, vector<4x4xbf16>
    tpu.vector_store %arg15[%c24_75, %c4_76], %55 {strides = array<i32>} : memref<48x16xbf16, #tpu.memory_space<vmem>>, vector<4x4xbf16>,
    %c0_77 = arith.constant 0 : index
    %c12_78 = arith.constant 12 : index
    %c4_79 = arith.constant 4 : index
    %57 = vector.load %arg1[%c0_77, %c12_78, %c4_79] : memref<1x16x13xbf16, #tpu.memory_space<vmem>>, vector<1x4x4xbf16>
    %58 = vector.shape_cast %57 : vector<1x4x4xbf16> to vector<4x4xbf16>
    %c28_80 = arith.constant 28 : index
    %c4_81 = arith.constant 4 : index
    %59 = vector.load %arg15[%c28_80, %c4_81] : memref<48x16xbf16, #tpu.memory_space<vmem>>, vector<4x4xbf16>
    tpu.vector_store %arg15[%c28_80, %c4_81], %58 {strides = array<i32>} : memref<48x16xbf16, #tpu.memory_space<vmem>>, vector<4x4xbf16>,
    %c0_82 = arith.constant 0 : index
    %c12_83 = arith.constant 12 : index
    %c7_84 = arith.constant 7 : index
    %60 = vector.load %arg1[%c0_82, %c12_83, %c7_84] : memref<1x16x13xbf16, #tpu.memory_space<vmem>>, vector<1x4x4xbf16>
    %61 = vector.shape_cast %60 : vector<1x4x4xbf16> to vector<4x4xbf16>
    %c32_85 = arith.constant 32 : index
    %c4_86 = arith.constant 4 : index
    %62 = vector.load %arg15[%c32_85, %c4_86] : memref<48x16xbf16, #tpu.memory_space<vmem>>, vector<4x4xbf16>
    tpu.vector_store %arg15[%c32_85, %c4_86], %61 {strides = array<i32>} : memref<48x16xbf16, #tpu.memory_space<vmem>>, vector<4x4xbf16>,
    %c0_87 = arith.constant 0 : index
    %c4_88 = arith.constant 4 : index
    %c0_89 = arith.constant 0 : index
    %63 = vector.load %arg1[%c0_87, %c4_88, %c0_89] : memref<1x16x13xbf16, #tpu.memory_space<vmem>>, vector<1x4x4xbf16>
    %64 = vector.shape_cast %63 : vector<1x4x4xbf16> to vector<4x4xbf16>
    %c36_90 = arith.constant 36 : index
    %c4_91 = arith.constant 4 : index
    %65 = vector.load %arg15[%c36_90, %c4_91] : memref<48x16xbf16, #tpu.memory_space<vmem>>, vector<4x4xbf16>
    tpu.vector_store %arg15[%c36_90, %c4_91], %64 {strides = array<i32>} : memref<48x16xbf16, #tpu.memory_space<vmem>>, vector<4x4xbf16>,
    %c0_92 = arith.constant 0 : index
    %c12_93 = arith.constant 12 : index
    %c4_94 = arith.constant 4 : index
    %66 = vector.load %arg1[%c0_92, %c12_93, %c4_94] : memref<1x16x13xbf16, #tpu.memory_space<vmem>>, vector<1x4x4xbf16>
    %67 = vector.shape_cast %66 : vector<1x4x4xbf16> to vector<4x4xbf16>
    %c40_95 = arith.constant 40 : index
    %c4_96 = arith.constant 4 : index
    %68 = vector.load %arg15[%c40_95, %c4_96] : memref<48x16xbf16, #tpu.memory_space<vmem>>, vector<4x4xbf16>
    tpu.vector_store %arg15[%c40_95, %c4_96], %67 {strides = array<i32>} : memref<48x16xbf16, #tpu.memory_space<vmem>>, vector<4x4xbf16>,
    %c0_97 = arith.constant 0 : index
    %c4_98 = arith.constant 4 : index
    %c9_99 = arith.constant 9 : index
    %69 = vector.load %arg1[%c0_97, %c4_98, %c9_99] : memref<1x16x13xbf16, #tpu.memory_space<vmem>>, vector<1x4x4xbf16>
    %70 = vector.shape_cast %69 : vector<1x4x4xbf16> to vector<4x4xbf16>
    %c44_100 = arith.constant 44 : index
    %c4_101 = arith.constant 4 : index
    %71 = vector.load %arg15[%c44_100, %c4_101] : memref<48x16xbf16, #tpu.memory_space<vmem>>, vector<4x4xbf16>
    tpu.vector_store %arg15[%c44_100, %c4_101], %70 {strides = array<i32>} : memref<48x16xbf16, #tpu.memory_space<vmem>>, vector<4x4xbf16>,
    %c0_102 = arith.constant 0 : index
    %c12_103 = arith.constant 12 : index
    %c4_104 = arith.constant 4 : index
    %72 = vector.load %arg1[%c0_102, %c12_103, %c4_104] : memref<1x16x13xbf16, #tpu.memory_space<vmem>>, vector<1x4x4xbf16>
    %73 = vector.shape_cast %72 : vector<1x4x4xbf16> to vector<4x4xbf16>
    %c0_105 = arith.constant 0 : index
    %c8_106 = arith.constant 8 : index
    %74 = vector.load %arg15[%c0_105, %c8_106] : memref<48x16xbf16, #tpu.memory_space<vmem>>, vector<4x4xbf16>
    tpu.vector_store %arg15[%c0_105, %c8_106], %73 {strides = array<i32>} : memref<48x16xbf16, #tpu.memory_space<vmem>>, vector<4x4xbf16>,
    %c0_107 = arith.constant 0 : index
    %c0_108 = arith.constant 0 : index
    %c5_109 = arith.constant 5 : index
    %75 = vector.load %arg1[%c0_107, %c0_108, %c5_109] : memref<1x16x13xbf16, #tpu.memory_space<vmem>>, vector<1x4x4xbf16>
    %76 = vector.shape_cast %75 : vector<1x4x4xbf16> to vector<4x4xbf16>
    %c4_110 = arith.constant 4 : index
    %c8_111 = arith.constant 8 : index
    %77 = vector.load %arg15[%c4_110, %c8_111] : memref<48x16xbf16, #tpu.memory_space<vmem>>, vector<4x4xbf16>
    tpu.vector_store %arg15[%c4_110, %c8_111], %76 {strides = array<i32>} : memref<48x16xbf16, #tpu.memory_space<vmem>>, vector<4x4xbf16>,
    %c0_112 = arith.constant 0 : index
    %c4_113 = arith.constant 4 : index
    %c5_114 = arith.constant 5 : index
    %78 = vector.load %arg1[%c0_112, %c4_113, %c5_114] : memref<1x16x13xbf16, #tpu.memory_space<vmem>>, vector<1x4x4xbf16>
    %79 = vector.shape_cast %78 : vector<1x4x4xbf16> to vector<4x4xbf16>
    %c8_115 = arith.constant 8 : index
    %c8_116 = arith.constant 8 : index
    %80 = vector.load %arg15[%c8_115, %c8_116] : memref<48x16xbf16, #tpu.memory_space<vmem>>, vector<4x4xbf16>
    tpu.vector_store %arg15[%c8_115, %c8_116], %79 {strides = array<i32>} : memref<48x16xbf16, #tpu.memory_space<vmem>>, vector<4x4xbf16>,
    %c0_117 = arith.constant 0 : index
    %c8_118 = arith.constant 8 : index
    %c3_119 = arith.constant 3 : index
    %81 = vector.load %arg1[%c0_117, %c8_118, %c3_119] : memref<1x16x13xbf16, #tpu.memory_space<vmem>>, vector<1x4x4xbf16>
    %82 = vector.shape_cast %81 : vector<1x4x4xbf16> to vector<4x4xbf16>
    %c12_120 = arith.constant 12 : index
    %c8_121 = arith.constant 8 : index
    %83 = vector.load %arg15[%c12_120, %c8_121] : memref<48x16xbf16, #tpu.memory_space<vmem>>, vector<4x4xbf16>
    tpu.vector_store %arg15[%c12_120, %c8_121], %82 {strides = array<i32>} : memref<48x16xbf16, #tpu.memory_space<vmem>>, vector<4x4xbf16>,
    %c0_122 = arith.constant 0 : index
    %c0_123 = arith.constant 0 : index
    %c5_124 = arith.constant 5 : index
    %84 = vector.load %arg1[%c0_122, %c0_123, %c5_124] : memref<1x16x13xbf16, #tpu.memory_space<vmem>>, vector<1x4x4xbf16>
    %85 = vector.shape_cast %84 : vector<1x4x4xbf16> to vector<4x4xbf16>
    %c16_125 = arith.constant 16 : index
    %c8_126 = arith.constant 8 : index
    %86 = vector.load %arg15[%c16_125, %c8_126] : memref<48x16xbf16, #tpu.memory_space<vmem>>, vector<4x4xbf16>
    tpu.vector_store %arg15[%c16_125, %c8_126], %85 {strides = array<i32>} : memref<48x16xbf16, #tpu.memory_space<vmem>>, vector<4x4xbf16>,
    %c0_127 = arith.constant 0 : index
    %c8_128 = arith.constant 8 : index
    %c6_129 = arith.constant 6 : index
    %87 = vector.load %arg1[%c0_127, %c8_128, %c6_129] : memref<1x16x13xbf16, #tpu.memory_space<vmem>>, vector<1x4x4xbf16>
    %88 = vector.shape_cast %87 : vector<1x4x4xbf16> to vector<4x4xbf16>
    %c20_130 = arith.constant 20 : index
    %c8_131 = arith.constant 8 : index
    %89 = vector.load %arg15[%c20_130, %c8_131] : memref<48x16xbf16, #tpu.memory_space<vmem>>, vector<4x4xbf16>
    tpu.vector_store %arg15[%c20_130, %c8_131], %88 {strides = array<i32>} : memref<48x16xbf16, #tpu.memory_space<vmem>>, vector<4x4xbf16>,
    %c0_132 = arith.constant 0 : index
    %c0_133 = arith.constant 0 : index
    %c2 = arith.constant 2 : index
    %90 = vector.load %arg1[%c0_132, %c0_133, %c2] : memref<1x16x13xbf16, #tpu.memory_space<vmem>>, vector<1x4x4xbf16>
    %91 = vector.shape_cast %90 : vector<1x4x4xbf16> to vector<4x4xbf16>
    %c24_134 = arith.constant 24 : index
    %c8_135 = arith.constant 8 : index
    %92 = vector.load %arg15[%c24_134, %c8_135] : memref<48x16xbf16, #tpu.memory_space<vmem>>, vector<4x4xbf16>
    tpu.vector_store %arg15[%c24_134, %c8_135], %91 {strides = array<i32>} : memref<48x16xbf16, #tpu.memory_space<vmem>>, vector<4x4xbf16>,
    %c0_136 = arith.constant 0 : index
    %c0_137 = arith.constant 0 : index
    %c5_138 = arith.constant 5 : index
    %93 = vector.load %arg1[%c0_136, %c0_137, %c5_138] : memref<1x16x13xbf16, #tpu.memory_space<vmem>>, vector<1x4x4xbf16>
    %94 = vector.shape_cast %93 : vector<1x4x4xbf16> to vector<4x4xbf16>
    %c28_139 = arith.constant 28 : index
    %c8_140 = arith.constant 8 : index
    %95 = vector.load %arg15[%c28_139, %c8_140] : memref<48x16xbf16, #tpu.memory_space<vmem>>, vector<4x4xbf16>
    tpu.vector_store %arg15[%c28_139, %c8_140], %94 {strides = array<i32>} : memref<48x16xbf16, #tpu.memory_space<vmem>>, vector<4x4xbf16>,
    %c0_141 = arith.constant 0 : index
    %c0_142 = arith.constant 0 : index
    %c8_143 = arith.constant 8 : index
    %96 = vector.load %arg1[%c0_141, %c0_142, %c8_143] : memref<1x16x13xbf16, #tpu.memory_space<vmem>>, vector<1x4x4xbf16>
    %97 = vector.shape_cast %96 : vector<1x4x4xbf16> to vector<4x4xbf16>
    %c32_144 = arith.constant 32 : index
    %c8_145 = arith.constant 8 : index
    %98 = vector.load %arg15[%c32_144, %c8_145] : memref<48x16xbf16, #tpu.memory_space<vmem>>, vector<4x4xbf16>
    tpu.vector_store %arg15[%c32_144, %c8_145], %97 {strides = array<i32>} : memref<48x16xbf16, #tpu.memory_space<vmem>>, vector<4x4xbf16>,
    %c0_146 = arith.constant 0 : index
    %c8_147 = arith.constant 8 : index
    %c0_148 = arith.constant 0 : index
    %99 = vector.load %arg1[%c0_146, %c8_147, %c0_148] : memref<1x16x13xbf16, #tpu.memory_space<vmem>>, vector<1x4x4xbf16>
    %100 = vector.shape_cast %99 : vector<1x4x4xbf16> to vector<4x4xbf16>
    %c36_149 = arith.constant 36 : index
    %c8_150 = arith.constant 8 : index
    %101 = vector.load %arg15[%c36_149, %c8_150] : memref<48x16xbf16, #tpu.memory_space<vmem>>, vector<4x4xbf16>
    tpu.vector_store %arg15[%c36_149, %c8_150], %100 {strides = array<i32>} : memref<48x16xbf16, #tpu.memory_space<vmem>>, vector<4x4xbf16>,
    %c0_151 = arith.constant 0 : index
    %c0_152 = arith.constant 0 : index
    %c5_153 = arith.constant 5 : index
    %102 = vector.load %arg1[%c0_151, %c0_152, %c5_153] : memref<1x16x13xbf16, #tpu.memory_space<vmem>>, vector<1x4x4xbf16>
    %103 = vector.shape_cast %102 : vector<1x4x4xbf16> to vector<4x4xbf16>
    %c40_154 = arith.constant 40 : index
    %c8_155 = arith.constant 8 : index
    %104 = vector.load %arg15[%c40_154, %c8_155] : memref<48x16xbf16, #tpu.memory_space<vmem>>, vector<4x4xbf16>
    tpu.vector_store %arg15[%c40_154, %c8_155], %103 {strides = array<i32>} : memref<48x16xbf16, #tpu.memory_space<vmem>>, vector<4x4xbf16>,
    %c0_156 = arith.constant 0 : index
    %c8_157 = arith.constant 8 : index
    %c9_158 = arith.constant 9 : index
    %105 = vector.load %arg1[%c0_156, %c8_157, %c9_158] : memref<1x16x13xbf16, #tpu.memory_space<vmem>>, vector<1x4x4xbf16>
    %106 = vector.shape_cast %105 : vector<1x4x4xbf16> to vector<4x4xbf16>
    %c44_159 = arith.constant 44 : index
    %c8_160 = arith.constant 8 : index
    %107 = vector.load %arg15[%c44_159, %c8_160] : memref<48x16xbf16, #tpu.memory_space<vmem>>, vector<4x4xbf16>
    tpu.vector_store %arg15[%c44_159, %c8_160], %106 {strides = array<i32>} : memref<48x16xbf16, #tpu.memory_space<vmem>>, vector<4x4xbf16>,
    %c0_161 = arith.constant 0 : index
    %c0_162 = arith.constant 0 : index
    %c5_163 = arith.constant 5 : index
    %108 = vector.load %arg1[%c0_161, %c0_162, %c5_163] : memref<1x16x13xbf16, #tpu.memory_space<vmem>>, vector<1x4x4xbf16>
    %109 = vector.shape_cast %108 : vector<1x4x4xbf16> to vector<4x4xbf16>
    %c0_164 = arith.constant 0 : index
    %c12_165 = arith.constant 12 : index
    %110 = vector.load %arg15[%c0_164, %c12_165] : memref<48x16xbf16, #tpu.memory_space<vmem>>, vector<4x4xbf16>
    tpu.vector_store %arg15[%c0_164, %c12_165], %109 {strides = array<i32>} : memref<48x16xbf16, #tpu.memory_space<vmem>>, vector<4x4xbf16>,
    %c0_166 = arith.constant 0 : index
    %c4_167 = arith.constant 4 : index
    %c5_168 = arith.constant 5 : index
    %111 = vector.load %arg1[%c0_166, %c4_167, %c5_168] : memref<1x16x13xbf16, #tpu.memory_space<vmem>>, vector<1x4x4xbf16>
    %112 = vector.shape_cast %111 : vector<1x4x4xbf16> to vector<4x4xbf16>
    %c4_169 = arith.constant 4 : index
    %c12_170 = arith.constant 12 : index
    %113 = vector.load %arg15[%c4_169, %c12_170] : memref<48x16xbf16, #tpu.memory_space<vmem>>, vector<4x4xbf16>
    tpu.vector_store %arg15[%c4_169, %c12_170], %112 {strides = array<i32>} : memref<48x16xbf16, #tpu.memory_space<vmem>>, vector<4x4xbf16>,
    %c0_171 = arith.constant 0 : index
    %c8_172 = arith.constant 8 : index
    %c5_173 = arith.constant 5 : index
    %114 = vector.load %arg1[%c0_171, %c8_172, %c5_173] : memref<1x16x13xbf16, #tpu.memory_space<vmem>>, vector<1x4x4xbf16>
    %115 = vector.shape_cast %114 : vector<1x4x4xbf16> to vector<4x4xbf16>
    %c8_174 = arith.constant 8 : index
    %c12_175 = arith.constant 12 : index
    %116 = vector.load %arg15[%c8_174, %c12_175] : memref<48x16xbf16, #tpu.memory_space<vmem>>, vector<4x4xbf16>
    tpu.vector_store %arg15[%c8_174, %c12_175], %115 {strides = array<i32>} : memref<48x16xbf16, #tpu.memory_space<vmem>>, vector<4x4xbf16>,
    %c0_176 = arith.constant 0 : index
    %c12_177 = arith.constant 12 : index
    %c3_178 = arith.constant 3 : index
    %117 = vector.load %arg1[%c0_176, %c12_177, %c3_178] : memref<1x16x13xbf16, #tpu.memory_space<vmem>>, vector<1x4x4xbf16>
    %118 = vector.shape_cast %117 : vector<1x4x4xbf16> to vector<4x4xbf16>
    %c12_179 = arith.constant 12 : index
    %c12_180 = arith.constant 12 : index
    %119 = vector.load %arg15[%c12_179, %c12_180] : memref<48x16xbf16, #tpu.memory_space<vmem>>, vector<4x4xbf16>
    tpu.vector_store %arg15[%c12_179, %c12_180], %118 {strides = array<i32>} : memref<48x16xbf16, #tpu.memory_space<vmem>>, vector<4x4xbf16>,
    %c0_181 = arith.constant 0 : index
    %c4_182 = arith.constant 4 : index
    %c5_183 = arith.constant 5 : index
    %120 = vector.load %arg1[%c0_181, %c4_182, %c5_183] : memref<1x16x13xbf16, #tpu.memory_space<vmem>>, vector<1x4x4xbf16>
    %121 = vector.shape_cast %120 : vector<1x4x4xbf16> to vector<4x4xbf16>
    %c16_184 = arith.constant 16 : index
    %c12_185 = arith.constant 12 : index
    %122 = vector.load %arg15[%c16_184, %c12_185] : memref<48x16xbf16, #tpu.memory_space<vmem>>, vector<4x4xbf16>
    tpu.vector_store %arg15[%c16_184, %c12_185], %121 {strides = array<i32>} : memref<48x16xbf16, #tpu.memory_space<vmem>>, vector<4x4xbf16>,
    %c0_186 = arith.constant 0 : index
    %c12_187 = arith.constant 12 : index
    %c6_188 = arith.constant 6 : index
    %123 = vector.load %arg1[%c0_186, %c12_187, %c6_188] : memref<1x16x13xbf16, #tpu.memory_space<vmem>>, vector<1x4x4xbf16>
    %124 = vector.shape_cast %123 : vector<1x4x4xbf16> to vector<4x4xbf16>
    %c20_189 = arith.constant 20 : index
    %c12_190 = arith.constant 12 : index
    %125 = vector.load %arg15[%c20_189, %c12_190] : memref<48x16xbf16, #tpu.memory_space<vmem>>, vector<4x4xbf16>
    tpu.vector_store %arg15[%c20_189, %c12_190], %124 {strides = array<i32>} : memref<48x16xbf16, #tpu.memory_space<vmem>>, vector<4x4xbf16>,
    %c0_191 = arith.constant 0 : index
    %c4_192 = arith.constant 4 : index
    %c2_193 = arith.constant 2 : index
    %126 = vector.load %arg1[%c0_191, %c4_192, %c2_193] : memref<1x16x13xbf16, #tpu.memory_space<vmem>>, vector<1x4x4xbf16>
    %127 = vector.shape_cast %126 : vector<1x4x4xbf16> to vector<4x4xbf16>
    %c24_194 = arith.constant 24 : index
    %c12_195 = arith.constant 12 : index
    %128 = vector.load %arg15[%c24_194, %c12_195] : memref<48x16xbf16, #tpu.memory_space<vmem>>, vector<4x4xbf16>
    tpu.vector_store %arg15[%c24_194, %c12_195], %127 {strides = array<i32>} : memref<48x16xbf16, #tpu.memory_space<vmem>>, vector<4x4xbf16>,
    %c0_196 = arith.constant 0 : index
    %c4_197 = arith.constant 4 : index
    %c5_198 = arith.constant 5 : index
    %129 = vector.load %arg1[%c0_196, %c4_197, %c5_198] : memref<1x16x13xbf16, #tpu.memory_space<vmem>>, vector<1x4x4xbf16>
    %130 = vector.shape_cast %129 : vector<1x4x4xbf16> to vector<4x4xbf16>
    %c28_199 = arith.constant 28 : index
    %c12_200 = arith.constant 12 : index
    %131 = vector.load %arg15[%c28_199, %c12_200] : memref<48x16xbf16, #tpu.memory_space<vmem>>, vector<4x4xbf16>
    tpu.vector_store %arg15[%c28_199, %c12_200], %130 {strides = array<i32>} : memref<48x16xbf16, #tpu.memory_space<vmem>>, vector<4x4xbf16>,
    %c0_201 = arith.constant 0 : index
    %c4_202 = arith.constant 4 : index
    %c8_203 = arith.constant 8 : index
    %132 = vector.load %arg1[%c0_201, %c4_202, %c8_203] : memref<1x16x13xbf16, #tpu.memory_space<vmem>>, vector<1x4x4xbf16>
    %133 = vector.shape_cast %132 : vector<1x4x4xbf16> to vector<4x4xbf16>
    %c32_204 = arith.constant 32 : index
    %c12_205 = arith.constant 12 : index
    %134 = vector.load %arg15[%c32_204, %c12_205] : memref<48x16xbf16, #tpu.memory_space<vmem>>, vector<4x4xbf16>
    tpu.vector_store %arg15[%c32_204, %c12_205], %133 {strides = array<i32>} : memref<48x16xbf16, #tpu.memory_space<vmem>>, vector<4x4xbf16>,
    %c0_206 = arith.constant 0 : index
    %c12_207 = arith.constant 12 : index
    %c0_208 = arith.constant 0 : index
    %135 = vector.load %arg1[%c0_206, %c12_207, %c0_208] : memref<1x16x13xbf16, #tpu.memory_space<vmem>>, vector<1x4x4xbf16>
    %136 = vector.shape_cast %135 : vector<1x4x4xbf16> to vector<4x4xbf16>
    %c36_209 = arith.constant 36 : index
    %c12_210 = arith.constant 12 : index
    %137 = vector.load %arg15[%c36_209, %c12_210] : memref<48x16xbf16, #tpu.memory_space<vmem>>, vector<4x4xbf16>
    tpu.vector_store %arg15[%c36_209, %c12_210], %136 {strides = array<i32>} : memref<48x16xbf16, #tpu.memory_space<vmem>>, vector<4x4xbf16>,
    %c0_211 = arith.constant 0 : index
    %c4_212 = arith.constant 4 : index
    %c5_213 = arith.constant 5 : index
    %138 = vector.load %arg1[%c0_211, %c4_212, %c5_213] : memref<1x16x13xbf16, #tpu.memory_space<vmem>>, vector<1x4x4xbf16>
    %139 = vector.shape_cast %138 : vector<1x4x4xbf16> to vector<4x4xbf16>
    %c40_214 = arith.constant 40 : index
    %c12_215 = arith.constant 12 : index
    %140 = vector.load %arg15[%c40_214, %c12_215] : memref<48x16xbf16, #tpu.memory_space<vmem>>, vector<4x4xbf16>
    tpu.vector_store %arg15[%c40_214, %c12_215], %139 {strides = array<i32>} : memref<48x16xbf16, #tpu.memory_space<vmem>>, vector<4x4xbf16>,
    %c0_216 = arith.constant 0 : index
    %c12_217 = arith.constant 12 : index
    %c9_218 = arith.constant 9 : index
    %141 = vector.load %arg1[%c0_216, %c12_217, %c9_218] : memref<1x16x13xbf16, #tpu.memory_space<vmem>>, vector<1x4x4xbf16>
    %142 = vector.shape_cast %141 : vector<1x4x4xbf16> to vector<4x4xbf16>
    %c44_219 = arith.constant 44 : index
    %c12_220 = arith.constant 12 : index
    %143 = vector.load %arg15[%c44_219, %c12_220] : memref<48x16xbf16, #tpu.memory_space<vmem>>, vector<4x4xbf16>
    tpu.vector_store %arg15[%c44_219, %c12_220], %142 {strides = array<i32>} : memref<48x16xbf16, #tpu.memory_space<vmem>>, vector<4x4xbf16>,
    %c0_221 = arith.constant 0 : index
    %c0_222 = arith.constant 0 : index
    %144 = vector.load %arg2[%c0_221, %c0_222] : memref<16x48xbf16, #tpu.memory_space<vmem>>, vector<16x48xbf16>
    %c0_223 = arith.constant 0 : index
    %c0_224 = arith.constant 0 : index
    %145 = vector.load %arg15[%c0_223, %c0_224] : memref<48x16xbf16, #tpu.memory_space<vmem>>, vector<48x16xbf16>
    %cst = arith.constant dense<0.000000e+00> : vector<16x16xf32>
    %146 = tpu.matmul %144, %145, %cst {dimension_numbers = #tpu.dot_dimension_numbers<[1], [0], [0], [1], [0, 0, 1, 1], [], []>} : vector<16x48xbf16>, vector<48x16xbf16>, vector<16x16xf32> -> vector<16x16xf32>
    %147 = vector.extract_strided_slice %146 {offsets = [0, 0], sizes = [16, 4], strides = [1, 1]} : vector<16x16xf32> to vector<16x4xf32>
    %148 = vector.extract_strided_slice %146 {offsets = [0, 4], sizes = [16, 4], strides = [1, 1]} : vector<16x16xf32> to vector<16x4xf32>
    %149 = arith.maximumf %147, %148 : vector<16x4xf32>
    %150 = vector.extract_strided_slice %146 {offsets = [0, 8], sizes = [16, 4], strides = [1, 1]} : vector<16x16xf32> to vector<16x4xf32>
    %151 = vector.extract_strided_slice %146 {offsets = [0, 12], sizes = [16, 4], strides = [1, 1]} : vector<16x16xf32> to vector<16x4xf32>
    %152 = arith.maximumf %150, %151 : vector<16x4xf32>
    %153 = arith.maximumf %149, %152 : vector<16x4xf32>
    %c0_225 = arith.constant 0 : index
    %c0_226 = arith.constant 0 : index
    %154 = vector.load %arg3[%c0_225, %c0_226] : memref<16x1xf32, #tpu.memory_space<vmem>>, vector<16x1xf32>
    %155 = vector.broadcast %154 : vector<16x1xf32> to vector<16x4xf32>
    %156 = arith.addf %153, %155 : vector<16x4xf32>
    %cst_227 = arith.constant 0.000000e+00 : f32
    %157 = vector.broadcast %cst_227 : f32 to vector<16x4xf32>
    %158 = arith.maximumf %156, %157 : vector<16x4xf32>
    %c0_228 = arith.constant 0 : index
    %c0_229 = arith.constant 0 : index
    %159 = vector.load %arg17[%c0_228, %c0_229] : memref<16x4xf32, #tpu.memory_space<vmem>>, vector<16x4xf32>
    tpu.vector_store %arg17[%c0_228, %c0_229], %158 {strides = array<i32>} : memref<16x4xf32, #tpu.memory_space<vmem>>, vector<16x4xf32>,
    %cst_230 = arith.constant 0.000000e+00 : bf16
    %160 = vector.broadcast %cst_230 : bf16 to vector<16x2xbf16>
    %c0_231 = arith.constant 0 : index
    %c0_232 = arith.constant 0 : index
    %161 = vector.load %arg16[%c0_231, %c0_232] : memref<16x8xbf16, #tpu.memory_space<vmem>>, vector<16x2xbf16>
    tpu.vector_store %arg16[%c0_231, %c0_232], %160 {strides = array<i32>} : memref<16x8xbf16, #tpu.memory_space<vmem>>, vector<16x2xbf16>,
    %cst_233 = arith.constant 0.000000e+00 : bf16
    %162 = vector.broadcast %cst_233 : bf16 to vector<16x2xbf16>
    %c0_234 = arith.constant 0 : index
    %c6_235 = arith.constant 6 : index
    %163 = vector.load %arg16[%c0_234, %c6_235] : memref<16x8xbf16, #tpu.memory_space<vmem>>, vector<16x2xbf16>
    tpu.vector_store %arg16[%c0_234, %c6_235], %162 {strides = array<i32>} : memref<16x8xbf16, #tpu.memory_space<vmem>>, vector<16x2xbf16>,
    %164 = arith.truncf %158 : vector<16x4xf32> to vector<16x4xbf16>
    %c0_236 = arith.constant 0 : index
    %c2_237 = arith.constant 2 : index
    %165 = vector.load %arg16[%c0_236, %c2_237] : memref<16x8xbf16, #tpu.memory_space<vmem>>, vector<16x4xbf16>
    tpu.vector_store %arg16[%c0_236, %c2_237], %164 {strides = array<i32>} : memref<16x8xbf16, #tpu.memory_space<vmem>>, vector<16x4xbf16>,
    %c0_238 = arith.constant 0 : index
    %c0_239 = arith.constant 0 : index
    %c0_240 = arith.constant 0 : index
    %166 = vector.load %arg4[%c0_238, %c0_239, %c0_240] : memref<5x16x16xbf16, #tpu.memory_space<vmem>>, vector<1x16x16xbf16>
    %167 = vector.shape_cast %166 : vector<1x16x16xbf16> to vector<16x16xbf16>
    %c0_241 = arith.constant 0 : index
    %c0_242 = arith.constant 0 : index
    %168 = vector.load %arg16[%c0_241, %c0_242] : memref<16x8xbf16, #tpu.memory_space<vmem>>, vector<16x4xbf16>
    %cst_243 = arith.constant dense<0.000000e+00> : vector<16x4xf32>
    %169 = tpu.matmul %167, %168, %cst_243 {dimension_numbers = #tpu.dot_dimension_numbers<[1], [0], [0], [1], [0, 0, 1, 1], [], []>} : vector<16x16xbf16>, vector<16x4xbf16>, vector<16x4xf32> -> vector<16x4xf32>
    %c1_244 = arith.constant 1 : index
    %c0_245 = arith.constant 0 : index
    %c0_246 = arith.constant 0 : index
    %170 = vector.load %arg4[%c1_244, %c0_245, %c0_246] : memref<5x16x16xbf16, #tpu.memory_space<vmem>>, vector<1x16x16xbf16>
    %171 = vector.shape_cast %170 : vector<1x16x16xbf16> to vector<16x16xbf16>
    %c0_247 = arith.constant 0 : index
    %c1_248 = arith.constant 1 : index
    %172 = vector.load %arg16[%c0_247, %c1_248] : memref<16x8xbf16, #tpu.memory_space<vmem>>, vector<16x4xbf16>
    %cst_249 = arith.constant dense<0.000000e+00> : vector<16x4xf32>
    %173 = tpu.matmul %171, %172, %cst_249 {dimension_numbers = #tpu.dot_dimension_numbers<[1], [0], [0], [1], [0, 0, 1, 1], [], []>} : vector<16x16xbf16>, vector<16x4xbf16>, vector<16x4xf32> -> vector<16x4xf32>
    %174 = arith.addf %169, %173 : vector<16x4xf32>
    %c2_250 = arith.constant 2 : index
    %c0_251 = arith.constant 0 : index
    %c0_252 = arith.constant 0 : index
    %175 = vector.load %arg4[%c2_250, %c0_251, %c0_252] : memref<5x16x16xbf16, #tpu.memory_space<vmem>>, vector<1x16x16xbf16>
    %176 = vector.shape_cast %175 : vector<1x16x16xbf16> to vector<16x16xbf16>
    %c0_253 = arith.constant 0 : index
    %c2_254 = arith.constant 2 : index
    %177 = vector.load %arg16[%c0_253, %c2_254] : memref<16x8xbf16, #tpu.memory_space<vmem>>, vector<16x4xbf16>
    %cst_255 = arith.constant dense<0.000000e+00> : vector<16x4xf32>
    %178 = tpu.matmul %176, %177, %cst_255 {dimension_numbers = #tpu.dot_dimension_numbers<[1], [0], [0], [1], [0, 0, 1, 1], [], []>} : vector<16x16xbf16>, vector<16x4xbf16>, vector<16x4xf32> -> vector<16x4xf32>
    %179 = arith.addf %174, %178 : vector<16x4xf32>
    %c3_256 = arith.constant 3 : index
    %c0_257 = arith.constant 0 : index
    %c0_258 = arith.constant 0 : index
    %180 = vector.load %arg4[%c3_256, %c0_257, %c0_258] : memref<5x16x16xbf16, #tpu.memory_space<vmem>>, vector<1x16x16xbf16>
    %181 = vector.shape_cast %180 : vector<1x16x16xbf16> to vector<16x16xbf16>
    %c0_259 = arith.constant 0 : index
    %c3_260 = arith.constant 3 : index
    %182 = vector.load %arg16[%c0_259, %c3_260] : memref<16x8xbf16, #tpu.memory_space<vmem>>, vector<16x4xbf16>
    %cst_261 = arith.constant dense<0.000000e+00> : vector<16x4xf32>
    %183 = tpu.matmul %181, %182, %cst_261 {dimension_numbers = #tpu.dot_dimension_numbers<[1], [0], [0], [1], [0, 0, 1, 1], [], []>} : vector<16x16xbf16>, vector<16x4xbf16>, vector<16x4xf32> -> vector<16x4xf32>
    %184 = arith.addf %179, %183 : vector<16x4xf32>
    %c4_262 = arith.constant 4 : index
    %c0_263 = arith.constant 0 : index
    %c0_264 = arith.constant 0 : index
    %185 = vector.load %arg4[%c4_262, %c0_263, %c0_264] : memref<5x16x16xbf16, #tpu.memory_space<vmem>>, vector<1x16x16xbf16>
    %186 = vector.shape_cast %185 : vector<1x16x16xbf16> to vector<16x16xbf16>
    %c0_265 = arith.constant 0 : index
    %c4_266 = arith.constant 4 : index
    %187 = vector.load %arg16[%c0_265, %c4_266] : memref<16x8xbf16, #tpu.memory_space<vmem>>, vector<16x4xbf16>
    %cst_267 = arith.constant dense<0.000000e+00> : vector<16x4xf32>
    %188 = tpu.matmul %186, %187, %cst_267 {dimension_numbers = #tpu.dot_dimension_numbers<[1], [0], [0], [1], [0, 0, 1, 1], [], []>} : vector<16x16xbf16>, vector<16x4xbf16>, vector<16x4xf32> -> vector<16x4xf32>
    %189 = arith.addf %184, %188 : vector<16x4xf32>
    %c0_268 = arith.constant 0 : index
    %c0_269 = arith.constant 0 : index
    %190 = vector.load %arg5[%c0_268, %c0_269] : memref<16x1xf32, #tpu.memory_space<vmem>>, vector<16x1xf32>
    %191 = vector.broadcast %190 : vector<16x1xf32> to vector<16x4xf32>
    %192 = arith.addf %189, %191 : vector<16x4xf32>
    %cst_270 = arith.constant 0.000000e+00 : f32
    %193 = vector.broadcast %cst_270 : f32 to vector<16x4xf32>
    %194 = arith.maximumf %192, %193 : vector<16x4xf32>
    %195 = arith.truncf %194 : vector<16x4xf32> to vector<16x4xbf16>
    %c0_271 = arith.constant 0 : index
    %c2_272 = arith.constant 2 : index
    %196 = vector.load %arg16[%c0_271, %c2_272] : memref<16x8xbf16, #tpu.memory_space<vmem>>, vector<16x4xbf16>
    tpu.vector_store %arg16[%c0_271, %c2_272], %195 {strides = array<i32>} : memref<16x8xbf16, #tpu.memory_space<vmem>>, vector<16x4xbf16>,
    %c0_273 = arith.constant 0 : index
    %c0_274 = arith.constant 0 : index
    %c0_275 = arith.constant 0 : index
    %197 = vector.load %arg6[%c0_273, %c0_274, %c0_275] : memref<3x16x16xbf16, #tpu.memory_space<vmem>>, vector<1x16x16xbf16>
    %198 = vector.shape_cast %197 : vector<1x16x16xbf16> to vector<16x16xbf16>
    %c0_276 = arith.constant 0 : index
    %c1_277 = arith.constant 1 : index
    %199 = vector.load %arg16[%c0_276, %c1_277] : memref<16x8xbf16, #tpu.memory_space<vmem>>, vector<16x4xbf16>
    %cst_278 = arith.constant dense<0.000000e+00> : vector<16x4xf32>
    %200 = tpu.matmul %198, %199, %cst_278 {dimension_numbers = #tpu.dot_dimension_numbers<[1], [0], [0], [1], [0, 0, 1, 1], [], []>} : vector<16x16xbf16>, vector<16x4xbf16>, vector<16x4xf32> -> vector<16x4xf32>
    %c1_279 = arith.constant 1 : index
    %c0_280 = arith.constant 0 : index
    %c0_281 = arith.constant 0 : index
    %201 = vector.load %arg6[%c1_279, %c0_280, %c0_281] : memref<3x16x16xbf16, #tpu.memory_space<vmem>>, vector<1x16x16xbf16>
    %202 = vector.shape_cast %201 : vector<1x16x16xbf16> to vector<16x16xbf16>
    %c0_282 = arith.constant 0 : index
    %c2_283 = arith.constant 2 : index
    %203 = vector.load %arg16[%c0_282, %c2_283] : memref<16x8xbf16, #tpu.memory_space<vmem>>, vector<16x4xbf16>
    %cst_284 = arith.constant dense<0.000000e+00> : vector<16x4xf32>
    %204 = tpu.matmul %202, %203, %cst_284 {dimension_numbers = #tpu.dot_dimension_numbers<[1], [0], [0], [1], [0, 0, 1, 1], [], []>} : vector<16x16xbf16>, vector<16x4xbf16>, vector<16x4xf32> -> vector<16x4xf32>
    %205 = arith.addf %200, %204 : vector<16x4xf32>
    %c2_285 = arith.constant 2 : index
    %c0_286 = arith.constant 0 : index
    %c0_287 = arith.constant 0 : index
    %206 = vector.load %arg6[%c2_285, %c0_286, %c0_287] : memref<3x16x16xbf16, #tpu.memory_space<vmem>>, vector<1x16x16xbf16>
    %207 = vector.shape_cast %206 : vector<1x16x16xbf16> to vector<16x16xbf16>
    %c0_288 = arith.constant 0 : index
    %c3_289 = arith.constant 3 : index
    %208 = vector.load %arg16[%c0_288, %c3_289] : memref<16x8xbf16, #tpu.memory_space<vmem>>, vector<16x4xbf16>
    %cst_290 = arith.constant dense<0.000000e+00> : vector<16x4xf32>
    %209 = tpu.matmul %207, %208, %cst_290 {dimension_numbers = #tpu.dot_dimension_numbers<[1], [0], [0], [1], [0, 0, 1, 1], [], []>} : vector<16x16xbf16>, vector<16x4xbf16>, vector<16x4xf32> -> vector<16x4xf32>
    %210 = arith.addf %205, %209 : vector<16x4xf32>
    %c0_291 = arith.constant 0 : index
    %c0_292 = arith.constant 0 : index
    %211 = vector.load %arg7[%c0_291, %c0_292] : memref<16x1xf32, #tpu.memory_space<vmem>>, vector<16x1xf32>
    %212 = vector.broadcast %211 : vector<16x1xf32> to vector<16x4xf32>
    %213 = arith.addf %210, %212 : vector<16x4xf32>
    %cst_293 = arith.constant 0.000000e+00 : f32
    %214 = vector.broadcast %cst_293 : f32 to vector<16x4xf32>
    %215 = arith.maximumf %213, %214 : vector<16x4xf32>
    %cst_294 = arith.constant dense<0.000000e+00> : vector<16xf32>
    %216 = vector.multi_reduction <add>, %215, %cst_294 [1] : vector<16x4xf32> to vector<16xf32>
    %217 = vector.shape_cast %216 : vector<16xf32> to vector<16x1xf32>
    %cst_295 = arith.constant 4.000000e+00 : f32
    %218 = vector.broadcast %cst_295 : f32 to vector<16x1xf32>
    %219 = arith.divf %217, %218 : vector<16x1xf32>
    %c0_296 = arith.constant 0 : index
    %c0_297 = arith.constant 0 : index
    %220 = vector.load %arg18[%c0_296, %c0_297] : memref<16x2xf32, #tpu.memory_space<vmem>>, vector<16x1xf32>
    tpu.vector_store %arg18[%c0_296, %c0_297], %219 {strides = array<i32>} : memref<16x2xf32, #tpu.memory_space<vmem>>, vector<16x1xf32>,
    %cst_298 = arith.constant dense<0xFF800000> : vector<16xf32>
    %221 = vector.multi_reduction <maximumf>, %215, %cst_298 [1] : vector<16x4xf32> to vector<16xf32>
    %222 = vector.shape_cast %221 : vector<16xf32> to vector<16x1xf32>
    %c0_299 = arith.constant 0 : index
    %c1_300 = arith.constant 1 : index
    %223 = vector.load %arg18[%c0_299, %c1_300] : memref<16x2xf32, #tpu.memory_space<vmem>>, vector<16x1xf32>
    tpu.vector_store %arg18[%c0_299, %c1_300], %222 {strides = array<i32>} : memref<16x2xf32, #tpu.memory_space<vmem>>, vector<16x1xf32>,
    %c0_301 = arith.constant 0 : index
    %c0_302 = arith.constant 0 : index
    %224 = vector.load %arg8[%c0_301, %c0_302] : memref<4x16xf32, #tpu.memory_space<vmem>>, vector<4x16xf32>
    %c0_303 = arith.constant 0 : index
    %c0_304 = arith.constant 0 : index
    %225 = vector.load %arg18[%c0_303, %c0_304] : memref<16x2xf32, #tpu.memory_space<vmem>>, vector<16x2xf32>
    %cst_305 = arith.constant dense<0.000000e+00> : vector<4x2xf32>
    %226 = tpu.matmul %224, %225, %cst_305 {dimension_numbers = #tpu.dot_dimension_numbers<[1], [0], [0], [1], [0, 0, 1, 1], [], []>} : vector<4x16xf32>, vector<16x2xf32>, vector<4x2xf32> -> vector<4x2xf32>
    %c0_306 = arith.constant 0 : index
    %c0_307 = arith.constant 0 : index
    %227 = vector.load %arg9[%c0_306, %c0_307] : memref<4x1xf32, #tpu.memory_space<vmem>>, vector<4x1xf32>
    %228 = vector.broadcast %227 : vector<4x1xf32> to vector<4x2xf32>
    %229 = arith.addf %226, %228 : vector<4x2xf32>
    %cst_308 = arith.constant 0.000000e+00 : f32
    %230 = vector.broadcast %cst_308 : f32 to vector<4x2xf32>
    %231 = arith.maximumf %229, %230 : vector<4x2xf32>
    %c0_309 = arith.constant 0 : index
    %c0_310 = arith.constant 0 : index
    %232 = vector.load %arg10[%c0_309, %c0_310] : memref<16x4xf32, #tpu.memory_space<vmem>>, vector<16x4xf32>
    %cst_311 = arith.constant dense<0.000000e+00> : vector<16x2xf32>
    %233 = tpu.matmul %232, %231, %cst_311 {dimension_numbers = #tpu.dot_dimension_numbers<[1], [0], [0], [1], [0, 0, 1, 1], [], []>} : vector<16x4xf32>, vector<4x2xf32>, vector<16x2xf32> -> vector<16x2xf32>
    %c0_312 = arith.constant 0 : index
    %c0_313 = arith.constant 0 : index
    %234 = vector.load %arg11[%c0_312, %c0_313] : memref<16x1xf32, #tpu.memory_space<vmem>>, vector<16x1xf32>
    %235 = vector.broadcast %234 : vector<16x1xf32> to vector<16x2xf32>
    %236 = arith.addf %233, %235 : vector<16x2xf32>
    %237 = vector.extract_strided_slice %236 {offsets = [0, 0], sizes = [16, 1], strides = [1, 1]} : vector<16x2xf32> to vector<16x1xf32>
    %238 = vector.extract_strided_slice %236 {offsets = [0, 1], sizes = [16, 1], strides = [1, 1]} : vector<16x2xf32> to vector<16x1xf32>
    %239 = arith.addf %237, %238 : vector<16x1xf32>
    %240 = arith.negf %239 : vector<16x1xf32>
    %241 = math.exp %240 : vector<16x1xf32>
    %cst_314 = arith.constant 1.000000e+00 : f32
    %242 = vector.broadcast %cst_314 : f32 to vector<16x1xf32>
    %243 = arith.addf %242, %241 : vector<16x1xf32>
    %244 = arith.divf %242, %243 : vector<16x1xf32>
    %245 = vector.broadcast %244 : vector<16x1xf32> to vector<16x4xf32>
    %246 = arith.mulf %215, %245 : vector<16x4xf32>
    %cst_315 = arith.constant 0.000000e+00 : f32
    %247 = vector.broadcast %cst_315 : f32 to vector<2x3xf32>
    %c0_316 = arith.constant 0 : index
    %c0_317 = arith.constant 0 : index
    %248 = vector.load %arg19[%c0_316, %c0_317] : memref<2x10xf32, #tpu.memory_space<vmem>>, vector<2x3xf32>
    tpu.vector_store %arg19[%c0_316, %c0_317], %247 {strides = array<i32>} : memref<2x10xf32, #tpu.memory_space<vmem>>, vector<2x3xf32>,
    %cst_318 = arith.constant 0.000000e+00 : f32
    %249 = vector.broadcast %cst_318 : f32 to vector<2x3xf32>
    %c0_319 = arith.constant 0 : index
    %c7_320 = arith.constant 7 : index
    %250 = vector.load %arg19[%c0_319, %c7_320] : memref<2x10xf32, #tpu.memory_space<vmem>>, vector<2x3xf32>
    tpu.vector_store %arg19[%c0_319, %c7_320], %249 {strides = array<i32>} : memref<2x10xf32, #tpu.memory_space<vmem>>, vector<2x3xf32>,
    %cst_321 = arith.constant dense<0.000000e+00> : vector<4xf32>
    %251 = vector.multi_reduction <add>, %246, %cst_321 [0] : vector<16x4xf32> to vector<4xf32>
    %252 = vector.shape_cast %251 : vector<4xf32> to vector<1x4xf32>
    %cst_322 = arith.constant 1.600000e+01 : f32
    %253 = vector.broadcast %cst_322 : f32 to vector<1x4xf32>
    %254 = arith.divf %252, %253 : vector<1x4xf32>
    %c0_323 = arith.constant 0 : index
    %c3_324 = arith.constant 3 : index
    %255 = vector.load %arg19[%c0_323, %c3_324] : memref<2x10xf32, #tpu.memory_space<vmem>>, vector<1x4xf32>
    tpu.vector_store %arg19[%c0_323, %c3_324], %254 {strides = array<i32>} : memref<2x10xf32, #tpu.memory_space<vmem>>, vector<1x4xf32>,
    %cst_325 = arith.constant dense<0xFF800000> : vector<4xf32>
    %256 = vector.multi_reduction <maximumf>, %246, %cst_325 [0] : vector<16x4xf32> to vector<4xf32>
    %257 = vector.shape_cast %256 : vector<4xf32> to vector<1x4xf32>
    %c1_326 = arith.constant 1 : index
    %c3_327 = arith.constant 3 : index
    %258 = vector.load %arg19[%c1_326, %c3_327] : memref<2x10xf32, #tpu.memory_space<vmem>>, vector<1x4xf32>
    tpu.vector_store %arg19[%c1_326, %c3_327], %257 {strides = array<i32>} : memref<2x10xf32, #tpu.memory_space<vmem>>, vector<1x4xf32>,
    %c0_328 = arith.constant 0 : index
    %c0_329 = arith.constant 0 : index
    %259 = vector.load %arg12[%c0_328, %c0_329] : memref<2x7xf32, #tpu.memory_space<vmem>>, vector<2x1xf32>
    %c0_330 = arith.constant 0 : index
    %c0_331 = arith.constant 0 : index
    %260 = vector.load %arg19[%c0_330, %c0_331] : memref<2x10xf32, #tpu.memory_space<vmem>>, vector<2x4xf32>
    %261 = vector.broadcast %259 : vector<2x1xf32> to vector<2x4xf32>
    %262 = arith.mulf %261, %260 : vector<2x4xf32>
    %c0_332 = arith.constant 0 : index
    %c1_333 = arith.constant 1 : index
    %263 = vector.load %arg12[%c0_332, %c1_333] : memref<2x7xf32, #tpu.memory_space<vmem>>, vector<2x1xf32>
    %c0_334 = arith.constant 0 : index
    %c1_335 = arith.constant 1 : index
    %264 = vector.load %arg19[%c0_334, %c1_335] : memref<2x10xf32, #tpu.memory_space<vmem>>, vector<2x4xf32>
    %265 = vector.broadcast %263 : vector<2x1xf32> to vector<2x4xf32>
    %266 = arith.mulf %265, %264 : vector<2x4xf32>
    %267 = arith.addf %262, %266 : vector<2x4xf32>
    %c0_336 = arith.constant 0 : index
    %c2_337 = arith.constant 2 : index
    %268 = vector.load %arg12[%c0_336, %c2_337] : memref<2x7xf32, #tpu.memory_space<vmem>>, vector<2x1xf32>
    %c0_338 = arith.constant 0 : index
    %c2_339 = arith.constant 2 : index
    %269 = vector.load %arg19[%c0_338, %c2_339] : memref<2x10xf32, #tpu.memory_space<vmem>>, vector<2x4xf32>
    %270 = vector.broadcast %268 : vector<2x1xf32> to vector<2x4xf32>
    %271 = arith.mulf %270, %269 : vector<2x4xf32>
    %272 = arith.addf %267, %271 : vector<2x4xf32>
    %c0_340 = arith.constant 0 : index
    %c3_341 = arith.constant 3 : index
    %273 = vector.load %arg12[%c0_340, %c3_341] : memref<2x7xf32, #tpu.memory_space<vmem>>, vector<2x1xf32>
    %c0_342 = arith.constant 0 : index
    %c3_343 = arith.constant 3 : index
    %274 = vector.load %arg19[%c0_342, %c3_343] : memref<2x10xf32, #tpu.memory_space<vmem>>, vector<2x4xf32>
    %275 = vector.broadcast %273 : vector<2x1xf32> to vector<2x4xf32>
    %276 = arith.mulf %275, %274 : vector<2x4xf32>
    %277 = arith.addf %272, %276 : vector<2x4xf32>
    %c0_344 = arith.constant 0 : index
    %c4_345 = arith.constant 4 : index
    %278 = vector.load %arg12[%c0_344, %c4_345] : memref<2x7xf32, #tpu.memory_space<vmem>>, vector<2x1xf32>
    %c0_346 = arith.constant 0 : index
    %c4_347 = arith.constant 4 : index
    %279 = vector.load %arg19[%c0_346, %c4_347] : memref<2x10xf32, #tpu.memory_space<vmem>>, vector<2x4xf32>
    %280 = vector.broadcast %278 : vector<2x1xf32> to vector<2x4xf32>
    %281 = arith.mulf %280, %279 : vector<2x4xf32>
    %282 = arith.addf %277, %281 : vector<2x4xf32>
    %c0_348 = arith.constant 0 : index
    %c5_349 = arith.constant 5 : index
    %283 = vector.load %arg12[%c0_348, %c5_349] : memref<2x7xf32, #tpu.memory_space<vmem>>, vector<2x1xf32>
    %c0_350 = arith.constant 0 : index
    %c5_351 = arith.constant 5 : index
    %284 = vector.load %arg19[%c0_350, %c5_351] : memref<2x10xf32, #tpu.memory_space<vmem>>, vector<2x4xf32>
    %285 = vector.broadcast %283 : vector<2x1xf32> to vector<2x4xf32>
    %286 = arith.mulf %285, %284 : vector<2x4xf32>
    %287 = arith.addf %282, %286 : vector<2x4xf32>
    %c0_352 = arith.constant 0 : index
    %c6_353 = arith.constant 6 : index
    %288 = vector.load %arg12[%c0_352, %c6_353] : memref<2x7xf32, #tpu.memory_space<vmem>>, vector<2x1xf32>
    %c0_354 = arith.constant 0 : index
    %c6_355 = arith.constant 6 : index
    %289 = vector.load %arg19[%c0_354, %c6_355] : memref<2x10xf32, #tpu.memory_space<vmem>>, vector<2x4xf32>
    %290 = vector.broadcast %288 : vector<2x1xf32> to vector<2x4xf32>
    %291 = arith.mulf %290, %289 : vector<2x4xf32>
    %292 = arith.addf %287, %291 : vector<2x4xf32>
    %293 = vector.extract_strided_slice %292 {offsets = [0, 0], sizes = [1, 4], strides = [1, 1]} : vector<2x4xf32> to vector<1x4xf32>
    %294 = vector.extract_strided_slice %292 {offsets = [1, 0], sizes = [1, 4], strides = [1, 1]} : vector<2x4xf32> to vector<1x4xf32>
    %295 = arith.addf %293, %294 : vector<1x4xf32>
    %c0_356 = arith.constant 0 : index
    %296 = memref.load %arg13[%c0_356] : memref<1xf32, #tpu.memory_space<smem>>
    %297 = vector.broadcast %296 : f32 to vector<1x4xf32>
    %298 = arith.addf %295, %297 : vector<1x4xf32>
    %299 = arith.negf %298 : vector<1x4xf32>
    %300 = math.exp %299 : vector<1x4xf32>
    %cst_357 = arith.constant 1.000000e+00 : f32
    %301 = vector.broadcast %cst_357 : f32 to vector<1x4xf32>
    %302 = arith.addf %301, %300 : vector<1x4xf32>
    %303 = arith.divf %301, %302 : vector<1x4xf32>
    %304 = vector.broadcast %303 : vector<1x4xf32> to vector<16x4xf32>
    %305 = arith.mulf %246, %304 : vector<16x4xf32>
    %c0_358 = arith.constant 0 : index
    %c0_359 = arith.constant 0 : index
    %306 = vector.load %arg17[%c0_358, %c0_359] : memref<16x4xf32, #tpu.memory_space<vmem>>, vector<16x4xf32>
    %307 = arith.addf %305, %306 : vector<16x4xf32>
    %c0_360 = arith.constant 0 : index
    %c0_361 = arith.constant 0 : index
    %c0_362 = arith.constant 0 : index
    %308 = vector.load %arg14[%c0_360, %c0_361, %c0_362] : memref<1x16x4xf32, #tpu.memory_space<vmem>>, vector<1x16x4xf32>
    %309 = vector.shape_cast %308 : vector<1x16x4xf32> to vector<16x4xf32>
    %310 = vector.shape_cast %307 : vector<16x4xf32> to vector<1x16x4xf32>
    tpu.vector_store %arg14[%c0_360, %c0_361, %c0_362], %310 {strides = array<i32>} : memref<1x16x4xf32, #tpu.memory_space<vmem>>, vector<1x16x4xf32>,
    return
  }
  func.func @transform_0(%arg0: i32) -> (i32, i32, i32) {
    %c0_i32 = arith.constant 0 : i32
    %c0_i32_0 = arith.constant 0 : i32
    %c0_i32_1 = arith.constant 0 : i32
    return %arg0, %c0_i32, %c0_i32_0 : i32, i32, i32
  }
  func.func @transform_1(%arg0: i32) -> (i32, i32) {
    %c0_i32 = arith.constant 0 : i32
    %c0_i32_0 = arith.constant 0 : i32
    %c0_i32_1 = arith.constant 0 : i32
    return %c0_i32, %c0_i32_0 : i32, i32
  }
  func.func @transform_2(%arg0: i32) -> (i32, i32) {
    %c0_i32 = arith.constant 0 : i32
    %c0_i32_0 = arith.constant 0 : i32
    %c0_i32_1 = arith.constant 0 : i32
    return %c0_i32, %c0_i32_0 : i32, i32
  }
  func.func @transform_3(%arg0: i32) -> (i32, i32, i32) {
    %c0_i32 = arith.constant 0 : i32
    %c0_i32_0 = arith.constant 0 : i32
    %c0_i32_1 = arith.constant 0 : i32
    %c0_i32_2 = arith.constant 0 : i32
    return %c0_i32, %c0_i32_0, %c0_i32_1 : i32, i32, i32
  }
  func.func @transform_4(%arg0: i32) -> (i32, i32) {
    %c0_i32 = arith.constant 0 : i32
    %c0_i32_0 = arith.constant 0 : i32
    %c0_i32_1 = arith.constant 0 : i32
    return %c0_i32, %c0_i32_0 : i32, i32
  }
  func.func @transform_5(%arg0: i32) -> (i32, i32, i32) {
    %c0_i32 = arith.constant 0 : i32
    %c0_i32_0 = arith.constant 0 : i32
    %c0_i32_1 = arith.constant 0 : i32
    %c0_i32_2 = arith.constant 0 : i32
    return %c0_i32, %c0_i32_0, %c0_i32_1 : i32, i32, i32
  }
  func.func @transform_6(%arg0: i32) -> (i32, i32) {
    %c0_i32 = arith.constant 0 : i32
    %c0_i32_0 = arith.constant 0 : i32
    %c0_i32_1 = arith.constant 0 : i32
    return %c0_i32, %c0_i32_0 : i32, i32
  }
  func.func @transform_7(%arg0: i32) -> (i32, i32) {
    %c0_i32 = arith.constant 0 : i32
    %c0_i32_0 = arith.constant 0 : i32
    %c0_i32_1 = arith.constant 0 : i32
    return %c0_i32, %c0_i32_0 : i32, i32
  }
  func.func @transform_8(%arg0: i32) -> (i32, i32) {
    %c0_i32 = arith.constant 0 : i32
    %c0_i32_0 = arith.constant 0 : i32
    %c0_i32_1 = arith.constant 0 : i32
    return %c0_i32, %c0_i32_0 : i32, i32
  }
  func.func @transform_9(%arg0: i32) -> (i32, i32) {
    %c0_i32 = arith.constant 0 : i32
    %c0_i32_0 = arith.constant 0 : i32
    %c0_i32_1 = arith.constant 0 : i32
    return %c0_i32, %c0_i32_0 : i32, i32
  }
  func.func @transform_10(%arg0: i32) -> (i32, i32) {
    %c0_i32 = arith.constant 0 : i32
    %c0_i32_0 = arith.constant 0 : i32
    %c0_i32_1 = arith.constant 0 : i32
    return %c0_i32, %c0_i32_0 : i32, i32
  }
  func.func @transform_11(%arg0: i32) -> (i32, i32) {
    %c0_i32 = arith.constant 0 : i32
    %c0_i32_0 = arith.constant 0 : i32
    %c0_i32_1 = arith.constant 0 : i32
    return %c0_i32, %c0_i32_0 : i32, i32
  }
  func.func @transform_12(%arg0: i32) -> i32 {
    %c0_i32 = arith.constant 0 : i32
    %c0_i32_0 = arith.constant 0 : i32
    return %c0_i32 : i32
  }
  func.func @transform_13(%arg0: i32) -> (i32, i32, i32) {
    %c0_i32 = arith.constant 0 : i32
    %c0_i32_0 = arith.constant 0 : i32
    %c0_i32_1 = arith.constant 0 : i32
    return %arg0, %c0_i32, %c0_i32_0 : i32, i32, i32
  }
}

</mosaic_0001>

<bundles_post_ra>
// kernel: tpu_custom_call.1
= control target key start
LH: loop header
LB: loop body
LE: loop exit
PB: predicated region body
PF: predicated region fallthrough
CT: control target
= control target key end

     0   :  { %s2168_s27 = smov 0   ;;  %s2496_s0 = inlined_call_operand.vmem [shape: bf16[2,16,13], index: 0, kind: input, shape index: {}]   ;;  %s2497_s1 = inlined_call_operand.vmem [shape: bf16[16,48], index: 1, kind: input, shape index: {}]   ;;  %s2498_s2 = inlined_call_operand.vmem [shape: f32[16,1], index: 2, kind: input, shape index: {}]   ;;  %s2499_s3 = inlined_call_operand.vmem [shape: bf16[5,16,16], index: 3, kind: input, shape index: {}]   ;;  %s2500_s4 = inlined_call_operand.vmem [shape: f32[16,1], index: 4, kind: input, shape index: {}]   ;;  %s2501_s5 = inlined_call_operand.vmem [shape: bf16[3,16,16], index: 5, kind: input, shape index: {}]   ;;  %s2502_s6 = inlined_call_operand.vmem [shape: f32[16,1], index: 6, kind: input, shape index: {}]   ;;  %s2503_s7 = inlined_call_operand.vmem [shape: f32[4,16], index: 7, kind: input, shape index: {}]   ;;  %s2504_s8 = inlined_call_operand.vmem [shape: f32[4,1], index: 8, kind: input, shape index: {}]   ;;  %s2505_s9 = inlined_call_operand.vmem [shape: f32[16,4], index: 9, kind: input, shape index: {}]   ;;  %s2506_s10 = inlined_call_operand.vmem [shape: f32[16,1], index: 10, kind: input, shape index: {}]   ;;  %s2507_s11 = inlined_call_operand.vmem [shape: f32[2,7], index: 11, kind: input, shape index: {}]   ;;  %s2508_s12 = inlined_call_operand.<no memory space> [shape: f32[1], index: 12, kind: input, shape index: {}]   ;;  %s2509_s13 = inlined_call_operand.vmem [shape: f32[2,16,4], index: 13, kind: output, shape index: {}]  }
   0x1   :  { %18 = sst [smem:[#allocation7]] %s2508_s12 }
   0x2 LB: > { %s1814_s28 = sadd.s32 4294967295, %s2064_s27   ;;  %p1818_p0 = scmp.ge.s32.totalorder %s2064_s27, 1  ;;  %s2064_s27 = sphi %s2168_s27, %s24_s27  }
   0x3   : > { %p388_p1 = scmp.lt.s32.totalorder %s2064_s27, 3 }
   0x5   : > { %p389_p2 = pnand %p1818_p0, %p388_p1 }
   0x6   : > { %p432_p3 = scmp.lt.s32.totalorder (!%p389_p2), %s1814_s28, 1  ;;  %s2066_s15 = smov (!%p389_p2), 123  }
   0x7   : > { %392 = sbr.rel (%p389_p2) target bundleno = 2721 (0xaa1), region = 72  ;;  %s2067_s16 = smov (!%p389_p2), 121  }
   0x8   : > { %s2068_s17 = smov (!%p389_p2), 119   ;;  %s2069_s18 = smov (!%p389_p2), 124  }
   0x9   : > { %s2070_s19 = smov (!%p389_p2), 4   ;;  %s2071_s20 = smov (!%p389_p2), 125  }
   0xa   : > { %s2072_s21 = smov (!%p389_p2), 8   ;;  %s2073_s22 = smov (!%p389_p2), 3  }
   0xb   : > { %s2074_s23 = smov (!%p389_p2), 127   ;;  %s2075_s24 = smov (!%p389_p2), 12  }
   0xc   : > { %s2511_s28 = smov (!%p432_p3, %s1814_s28), 1  ;;  %s2076_s25 = smov 7   ;;  %vm458_vm0 = vcmask 27650   ;;  %v2077_v23 = vmov 0.0   ;;  %vm2085_vm1 = vmmov 0   ;;  %vm450_vm2 = vcmask 25600  }
   0xd   : > { %s1883_s12 = sshll.u32 %s2511_s28, 3  ;;  %1915 = vmatprep.subr.bf16.mxu0 %v2077_v23  ;;  %1925 = vmatprep.subr.bf16.mxu1 %v2077_v23  ;;  %s2078_s26 = smov 122   ;;  %vm529_vm3 = vcmask 60450   ;;  %vm526_vm4 = vcmask 58400   ;;  %vm598_vm5 = vcmask 91200   ;;  %vm606_vm6 = vcmask 93250  }
   0xe   : > { %s2182_s14 = scalar_lea.vmem %s2496_s0, %s1883_s12  ;;  %s2079_s12 = smov 126   ;;  %1921 = vmatprep.mubr.msk.bf16.mxu0 %vm2085_vm1, %v2077_v23  ;;  %1927 = vmatprep.mubr.msk.bf16.mxu1 %vm2085_vm1, %v2077_v23  ;;  %vm676_vm7 = vcmask 124000   ;;  %vm683_vm8 = vcmask 126050   ;;  %vm784_vm9 = vcmask 392192   ;;  %vm868_vm10 = vcmask 11264  }
   0xf   : > { %v585_v0 = vld [vmem:[%s2182_s14] sm:$0xc]  ;;  %v501_v1 = vld [vmem:[%s2182_s14 + $0x4] sm:$0x3]  ;;  %v518_v2 = vld [vmem:[%s2182_s14] sm:$0x3] }
  0x10   : > { %587 = vrot.lane.b32.xlu1 %v585_v0, %s2066_s15  ;;  %503 = vrot.lane.b32.xlu0 %v501_v1, %s2067_s16  ;;  %v520_v3 = vrot.slane %v518_v2, 6  ;;  %v512_v4 = vld [vmem:[%s2182_s14 + $0x4] sm:$0x3]  ;;  %v565_v5 = vld [vmem:[%s2182_s14 + $0x4] sm:$0xc]  ;;  %s2080_s29 = smov 2  }
  0x11   : > { %v1827_v6 = vrot.slane %v565_v5, 10  ;;  %v573_v7 = vld [vmem:[%s2182_s14] sm:$0xc]  ;;  %v651_v8 = vld [vmem:[%s2182_s14 + $0x4] sm:$0x3]  ;;  %s2081_s30 = smov 6  }
  0x12   : > { %v653_v9 = vrot.slane %v651_v8, 6  ;;  %v658_v10 = vld [vmem:[%s2182_s14] sm:$0x3]  ;;  %v664_v11 = vld [vmem:[%s2182_s14 + $0x4] sm:$0x3]  ;;  %s2082_s16 = smov 10  }
  0x13   : > { %v725_v12 = vld [vmem:[%s2182_s14] sm:$0xc]  ;;  %v666_v13 = vrot.slane %v664_v11, 6  ;;  %v733_v17 = vld [vmem:[%s2182_s14 + $0x4] sm:$0xc]  ;;  %vm871_vm11 = vcmask 60464  }
  0x14   : > { %521 = vrot.lane.b32.xlu1 %v520_v3, %s2068_s17  ;;  %514 = vrot.lane.b32.xlu0 %v512_v4, %s2069_s18  ;;  %v1833_v14 = vrot.slane %v725_v12, 10  ;;  %v739_v15 = vld [vmem:[%s2182_s14] sm:$0xc]  ;;  %v507_v18 = vld [vmem:[%s2182_s14] sm:$0x3]  ;;  %s2083_s17 = smov 1  }
  0x15   : > { %v1834_v16 = vrot.slane %v739_v15, 10  ;;  %v747_v19 = vld [vmem:[%s2182_s14 + $0x4] sm:$0xc]  ;;  %v481_v20 = vld [vmem:[%s2182_s14] sm:$0x3]  ;;  %v509_v21 = vrot.slane %v507_v18, 6 }
  0x16   : > { %v475_v22 = vld [vmem:[%s2182_s14 + $0x4] sm:$0x3]  ;;  %v483_v24 = vrot.slane %v481_v20, 6  ;;  %v555_v28 = vld [vmem:[%s2182_s14 + $0x4] sm:$0xc]  ;;  %vm865_vm12 = vcmask 31744  }
  0x17   : > { %511 = vst.msk [vmem:[#allocation2 + $0x10] sm:$0xc] %vm458_vm0, %v509_v21  ;;  %v494_v25 = vld [vmem:[%s2182_s14 + $0x4] sm:$0x3]  ;;  %v549_v29 = vld [vmem:[%s2182_s14] sm:$0xc] }
  0x18   : > { %575 = vrot.lane.b32.xlu0 %v573_v7, %s2070_s19  ;;  %569 = vrot.lane.b32.xlu1 %v1827_v6, %s2071_s20  ;;  %v488_v26 = vld [vmem:[%s2182_s14 + $0x4] sm:$0x3]  ;;  %v496_v27 = vrot.slane %v494_v25, 6  ;;  %v1826_v30 = vrot.slane %v555_v28, 10  ;;  %v623_v32 = vld [vmem:[%s2182_s14] sm:$0x3] }
  0x19   : > { %v629_v31 = vld [vmem:[%s2182_s14 + $0x4] sm:$0x3]  ;;  %v642_v34 = vld [vmem:[%s2182_s14] sm:$0x3]  ;;  %v697_v36 = vld [vmem:[%s2182_s14] sm:$0xc] }
  0x1a   : > { %v631_v33 = vrot.slane %v629_v31, 6  ;;  %v636_v35 = vld [vmem:[%s2182_s14] sm:$0x3]  ;;  %v644_v37 = vrot.slane %v642_v34, 6  ;;  %v1831_v38 = vrot.slane %v697_v36, 10  ;;  %vm886_vm13 = vcmask 44048  }
  0x1b   : > { %v711_v39 = vld [vmem:[%s2182_s14] sm:$0xc]  ;;  %v705_v41 = vld [vmem:[%s2182_s14 + $0x4] sm:$0xc]  ;;  %v452_v45 = vld [vmem:[%s2182_s14 + $0x4] sm:$0x3] }
  0x1c   : > { %654 = vrot.lane.b32.xlu0 %v653_v9, %s2072_s21  ;;  %660 = vrot.lane.b32.xlu1 %v658_v10, %s2073_s22  ;;  %v1832_v40 = vrot.slane %v711_v39, 10  ;;  %v443_v42 = vld [vmem:[%s2182_s14] sm:$0xc]  ;;  %v460_v46 = vld [vmem:[%s2182_s14 + $0x4] sm:$0xc]  ;;  %v454_v47 = vrot.slane %v452_v45, 6 }
  0x1d   : > { %v1823_v43 = vrot.slane %v443_v42, 10  ;;  %v719_v44 = vld [vmem:[%s2182_s14] sm:$0xc]  ;;  %v1824_v48 = vrot.slane %v460_v46, 10  ;;  %v468_v49 = vld [vmem:[%s2182_s14] sm:$0x3] }
  0x1e   : > { %v470_v50 = vrot.slane %v468_v49, 6  ;;  %v531_v51 = vld [vmem:[%s2182_s14] sm:$0x3]  ;;  %v591_v52 = vld [vmem:[%s2182_s14 + $0x4] sm:$0xc]  ;;  %s2084_s21 = smov 5  }
  0x1f   : > { %v1829_v53 = vrot.slane %v591_v52, 10  ;;  %v537_v54 = vld [vmem:[%s2182_s14] sm:$0xc]  ;;  %v600_v55 = vld [vmem:[%s2182_s14] sm:$0x3]  ;;  %vm909_vm14 = vcmask 130048  }
  0x20   : > { %667 = vrot.lane.b32.xlu0 %v666_v13, %s2074_s23  ;;  %729 = vrot.lane.b32.xlu1 %v1833_v14, %s2070_s19  ;;  %v608_v56 = vld [vmem:[%s2182_s14] sm:$0xc]  ;;  %v602_v57 = vrot.slane %v600_v55, 6  ;;  %v616_v59 = vld [vmem:[%s2182_s14 + $0x4] sm:$0x3]  ;;  %v2087_v55 = vmov 0  }
  0x21   : > { %v1830_v58 = vrot.slane %v608_v56, 10  ;;  %v618_v60 = vrot.slane %v616_v59, 6  ;;  %v671_v61 = vld [vmem:[%s2182_s14] sm:$0x3]  ;;  %v678_v62 = vld [vmem:[%s2182_s14] sm:$0xc]  ;;  %2022 = vset.pattern.permute.xlu1 %v2087_v55  ;;  %2023 = vset.pattern.permute.xlu0 %v2087_v55 }
  0x22   : > { %v685_v63 = vld [vmem:[%s2182_s14 + $0x4] sm:$0x3]  ;;  %v691_v0 = vld [vmem:[%s2182_s14 + $0x4] sm:$0xc]  ;;  %v649_v7 = vld [vmem:[%s2182_s14] sm:$0x3] }
  0x23   : > { %v579_v1 = vld [vmem:[%s2182_s14 + $0x4] sm:$0xc]  ;;  %869 = vst.msk [vmem:[#allocation3] sm:$0xf] %vm868_vm10, %v2087_v55  ;;  %870 = vst.msk [vmem:[#allocation3 + $0x4] sm:$0xf] %vm868_vm10, %v2087_v55 }
  0x24   : > { %735 = vrot.lane.b32.xlu0 %v733_v17, %s2075_s24  ;;  %743 = vrot.lane.b32.xlu1 %v1834_v16, %s2076_s25  ;;  %v1828_v4 = vrot.slane %v579_v1, 10  ;;  %v543_v14 = vld [vmem:[%s2182_s14 + $0x4] sm:$0xc]  ;;  %872 = vst.msk [vmem:[#allocation3] sm:$0xf] %vm871_vm11, %v2087_v55  ;;  %vm1403_vm15 = vcmask 7168  }
  0x25   : > { %v1825_v17 = vrot.slane %v543_v14, 10  ;;  %873 = vst.msk [vmem:[#allocation3 + $0x4] sm:$0xf] %vm871_vm11, %v2087_v55 }
  0x28   : > { %749 = vrot.lane.b32.xlu0 %v747_v19, %s2073_s22  ;;  %477 = vrot.lane.b32.xlu1 %v475_v22, %s2069_s18  ;;  %v563_v22 = vld [vmem:[%s2182_s14 + $0x4] sm:$0xc] }
  0x2c   : > { %484 = vrot.lane.b32.xlu0 %v483_v24, %s2078_s26  ;;  %490 = vrot.lane.b32.xlu1 %v488_v26, %s2074_s23 }
  0x30   : > { %497 = vrot.lane.b32.xlu0 %v496_v27, %s2069_s18  ;;  %551 = vrot.lane.b32.xlu1 %v549_v29, %s2079_s12 }
  0x34   : > { %559 = vrot.lane.b32.xlu0 %v1826_v30, %s2073_s22  ;;  %625 = vrot.lane.b32.xlu1 %v623_v32, %s2073_s22 }
  0x38   : > { %632 = vrot.lane.b32.xlu0 %v631_v33, %s2080_s29  ;;  %638 = vrot.lane.b32.xlu1 %v636_v35, %s2081_s30  ;;  %v525_v35 = vld [vmem:[%s2182_s14 + $0x4] sm:$0x3] }
  0x3c   : > { %645 = vrot.lane.b32.xlu0 %v644_v37, %s2073_s22  ;;  %701 = vrot.lane.b32.xlu1 %v1831_v38, %s2076_s25  ;;  %v528_v38 = vld [vmem:[%s2182_s14 + $0x4] sm:$0xc] }
  0x40   : > { %707 = vrot.lane.b32.xlu0 %v705_v41, %s2081_s30  ;;  %715 = vrot.lane.b32.xlu1 %v1832_v40, %s2082_s16 }
  0x44   : > { %721 = vrot.lane.b32.xlu0 %v719_v44, %s2076_s25  ;;  %447 = vrot.lane.b32.xlu1 %v1823_v43, %s2069_s18 }
  0x48   : > { %455 = vrot.lane.b32.xlu0 %v454_v47, %s2069_s18  ;;  %464 = vrot.lane.b32.xlu1 %v1824_v48, %s2069_s18 }
  0x4c   : > { %471 = vrot.lane.b32.xlu0 %v470_v50, %s2071_s20  ;;  %533 = vrot.lane.b32.xlu1 %v531_v51, %s2074_s23 }
  0x50   : > { %539 = vrot.lane.b32.xlu0 %v537_v54, %s2083_s17  ;;  %595 = vrot.lane.b32.xlu1 %v1829_v53, %s2070_s19  ;;  %s2086_s19 = smov 9   ;;  %v2035_v54 = vld [vmem:[%s2497_s1] sm:$0xff]  }
  0x54   : > { %603 = vrot.lane.b32.xlu0 %v602_v57, %s2073_s22  ;;  %612 = vrot.lane.b32.xlu1 %v1830_v58, %s2073_s22  ;;  %v849_v58 = vld [vmem:[%s2498_s2] sm:$0xff] }
  0x58   : > { %619 = vrot.lane.b32.xlu0 %v618_v60, %s2084_s21  ;;  %673 = vrot.lane.b32.xlu1 %v671_v61, %s2076_s25  ;;  %v850_v61 = vld [vmem:[%s2498_s2 + $0x8] sm:$0xff]  ;;  %s2088_s21 = smov 120  }
  0x5c   : > { %680 = vrot.lane.b32.xlu0 %v678_v62, %s2076_s25  ;;  %687 = vrot.lane.b32.xlu1 %v685_v63, %s2076_s25 }
  0x60   : > { %693 = vrot.lane.b32.xlu0 %v691_v0, %s2086_s19 }
  0x82   : > { %v588_v2 = vpop.permute.xlu1 %587  ;;  %v504_v3 = vpop.permute.xlu0 %503 }
  0x83   : > { %506 = vst.msk [vmem:[#allocation2 + $0x10] sm:$0x3] %vm450_vm2, %v504_v3 }
  0x86   : > { %v522_v5 = vpop.permute.xlu1 %521  ;;  %v515_v6 = vpop.permute.xlu0 %514 }
  0x87   : > { %524 = vst.msk [vmem:[#allocation2 + $0x14] sm:$0xc] %vm458_vm0, %v522_v5 }
  0x88   : > { %517 = vst.msk [vmem:[#allocation2 + $0x14] sm:$0x3] %vm450_vm2, %v515_v6 }
  0x89   : > { %590 = vst.msk [vmem:[#allocation2 + $0x14] sm:$0xc] %vm529_vm3, %v588_v2 }
  0x8a   : > { %584 = vst.msk [vmem:[#allocation2 + $0x14] sm:$0x3] %vm526_vm4, %v1828_v4  ;;  %v576_v8 = vpop.permute.xlu0 %575  ;;  %v570_v9 = vpop.permute.xlu1 %569 }
  0x8b   : > { %578 = vst.msk [vmem:[#allocation2 + $0x10] sm:$0xc] %vm529_vm3, %v576_v8 }
  0x8c   : > { %572 = vst.msk [vmem:[#allocation2 + $0x10] sm:$0x3] %vm526_vm4, %v570_v9 }
  0x8d   : > { %650 = vst.msk [vmem:[#allocation2 + $0x10] sm:$0x3] %vm598_vm5, %v649_v7 }
  0x8e   : > { %v655_v10 = vpop.permute.xlu0 %654  ;;  %v661_v11 = vpop.permute.xlu1 %660 }
  0x8f   : > { %657 = vst.msk [vmem:[#allocation2 + $0x10] sm:$0xc] %vm606_vm6, %v655_v10 }
  0x90   : > { %663 = vst.msk [vmem:[#allocation2 + $0x14] sm:$0x3] %vm598_vm5, %v661_v11 }
  0x92   : > { %v668_v12 = vpop.permute.xlu0 %667  ;;  %v730_v13 = vpop.permute.xlu1 %729 }
  0x93   : > { %670 = vst.msk [vmem:[#allocation2 + $0x14] sm:$0xc] %vm606_vm6, %v668_v12 }
  0x94   : > { %732 = vst.msk [vmem:[#allocation2 + $0x10] sm:$0x3] %vm676_vm7, %v730_v13 }
  0x96   : > { %v736_v15 = vpop.permute.xlu0 %735  ;;  %v744_v16 = vpop.permute.xlu1 %743 }
  0x97   : > { %738 = vst.msk [vmem:[#allocation2 + $0x10] sm:$0xc] %vm683_vm8, %v736_v15 }
  0x98   : > { %746 = vst.msk [vmem:[#allocation2 + $0x14] sm:$0x3] %vm676_vm7, %v744_v16 }
  0x9a   : > { %v750_v18 = vpop.permute.xlu0 %749  ;;  %v478_v19 = vpop.permute.xlu1 %477 }
  0x9b   : > { %752 = vst.msk [vmem:[#allocation2 + $0x14] sm:$0xc] %vm683_vm8, %v750_v18  ;;  %v1175_v18 = vld [vmem:[%s2500_s4] sm:$0xff] }
  0x9c   : > { %480 = vst.msk [vmem:[#allocation2 + $0x8] sm:$0x3] %vm450_vm2, %v478_v19 }
  0x9d   : > { %548 = vst.msk [vmem:[#allocation2 + $0x8] sm:$0x3] %vm526_vm4, %v1825_v17  ;;  %v1176_v17 = vld [vmem:[%s2500_s4 + $0x8] sm:$0xff] }
  0x9e   : > { %v485_v20 = vpop.permute.xlu0 %484  ;;  %v491_v21 = vpop.permute.xlu1 %490 }
  0x9f   : > { %487 = vst.msk [vmem:[#allocation2 + $0x8] sm:$0xc] %vm458_vm0, %v485_v20 }
  0xa0   : > { %493 = vst.msk [vmem:[#allocation2 + $0xc] sm:$0x3] %vm450_vm2, %v491_v21  ;;  %v2037_v21 = vld [vmem:[%s2499_s3 + $0x8] sm:$0xff]  }
  0xa2   : > { %v498_v24 = vpop.permute.xlu0 %497  ;;  %v2032_v25 = vld [vmem:[#allocation2 + $0x10] sm:$0xff]   ;;  %v552_v26 = vpop.permute.xlu1 %551 }
  0xa3   : > { %500 = vst.msk [vmem:[#allocation2 + $0xc] sm:$0xc] %vm458_vm0, %v498_v24  ;;  %1916 = vmatpush3.bf16.msra.mxu0 %v2032_v25  ;;  %v2039_v25 = vld [vmem:[%s2499_s3] sm:$0xff]  }
  0xa4   : > { %554 = vst.msk [vmem:[#allocation2 + $0x8] sm:$0xc] %vm529_vm3, %v552_v26  ;;  %564 = vst.msk [vmem:[#allocation2 + $0xc] sm:$0xc] %vm529_vm3, %v563_v22  ;;  %1917 = vmatprep.subr.bf16.mxu0 %v2077_v23  ;;  %v2038_v22 = vld [vmem:[%s2499_s3 + $0x10] sm:$0xff]   ;;  %v2040_v26 = vld [vmem:[%s2499_s3 + $0x20] sm:$0xff]  }
  0xa6   : > { %v560_v27 = vpop.permute.xlu0 %559  ;;  %v626_v28 = vpop.permute.xlu1 %625 }
  0xa7   : > { %562 = vst.msk [vmem:[#allocation2 + $0xc] sm:$0x3] %vm526_vm4, %v560_v27 }
  0xa8   : > { %628 = vst.msk [vmem:[#allocation2 + $0x8] sm:$0x3] %vm598_vm5, %v626_v28  ;;  %v2041_v28 = vld [vmem:[%s2499_s3 + $0x18] sm:$0xff]  }
  0xaa   : > { %v633_v29 = vpop.permute.xlu0 %632  ;;  %v639_v30 = vpop.permute.xlu1 %638 }
  0xab   : > { %635 = vst.msk [vmem:[#allocation2 + $0x8] sm:$0xc] %vm606_vm6, %v633_v29 }
  0xac   : > { %641 = vst.msk [vmem:[#allocation2 + $0xc] sm:$0x3] %vm598_vm5, %v639_v30 }
  0xae   : > { %v646_v31 = vpop.permute.xlu0 %645  ;;  %v702_v32 = vpop.permute.xlu1 %701 }
  0xaf   : > { %648 = vst.msk [vmem:[#allocation2 + $0xc] sm:$0xc] %vm606_vm6, %v646_v31 }
  0xb0   : > { %704 = vst.msk [vmem:[#allocation2 + $0x8] sm:$0x3] %vm676_vm7, %v702_v32 }
  0xb2   : > { %v708_v33 = vpop.permute.xlu0 %707  ;;  %v716_v34 = vpop.permute.xlu1 %715 }
  0xb3   : > { %710 = vst.msk [vmem:[#allocation2 + $0x8] sm:$0xc] %vm683_vm8, %v708_v33 }
  0xb4   : > { %718 = vst.msk [vmem:[#allocation2 + $0xc] sm:$0x3] %vm676_vm7, %v716_v34 }
  0xb6   : > { %v722_v36 = vpop.permute.xlu0 %721  ;;  %v448_v37 = vpop.permute.xlu1 %447 }
  0xb7   : > { %724 = vst.msk [vmem:[#allocation2 + $0xc] sm:$0xc] %vm683_vm8, %v722_v36 }
  0xb8   : > { %451 = vst.msk [vmem:[#allocation2] sm:$0x3] %vm450_vm2, %v448_v37 }
  0xb9   : > { %527 = vst.msk [vmem:[#allocation2] sm:$0x3] %vm526_vm4, %v525_v35 }
  0xba   : > { %v456_v39 = vpop.permute.xlu0 %455  ;;  %v465_v40 = vpop.permute.xlu1 %464 }
  0xbb   : > { %459 = vst.msk [vmem:[#allocation2] sm:$0xc] %vm458_vm0, %v456_v39 }
  0xbc   : > { %467 = vst.msk [vmem:[#allocation2 + $0x4] sm:$0x3] %vm450_vm2, %v465_v40  ;;  %vm1631_vm2 = vcmask 17408  }
  0xbd   : > { %530 = vst.msk [vmem:[#allocation2] sm:$0xc] %vm529_vm3, %v528_v38 }
  0xbe   : > { %v472_v41 = vpop.permute.xlu0 %471  ;;  %v2033_v42 = vld [vmem:[#allocation2 + $0x8] sm:$0xff]   ;;  %v534_v43 = vpop.permute.xlu1 %533  ;;  %1632 = vst.msk [vmem:[#allocation6] sm:$0x3] %vm1631_vm2, %v2077_v23 }
  0xbf   : > { %474 = vst.msk [vmem:[#allocation2 + $0x4] sm:$0xc] %vm458_vm0, %v472_v41  ;;  %1918 = vmatpush3.bf16.msra.mxu0 %v2033_v42  ;;  %vm1412_vm0 = vcmask 15368  }
  0xc0   : > { %536 = vst.msk [vmem:[#allocation2 + $0x4] sm:$0x3] %vm526_vm4, %v534_v43  ;;  %1919 = vmatprep.subr.bf16.mxu0 %v2077_v23  ;;  %vm1650_vm4 = vcmask 49176  }
  0xc2   : > { %v540_v44 = vpop.permute.xlu0 %539  ;;  %v596_v45 = vpop.permute.xlu1 %595 }
  0xc3   : > { %542 = vst.msk [vmem:[#allocation2 + $0x4] sm:$0xc] %vm529_vm3, %v540_v44  ;;  %vm1633_vm3 = vcmask 74808  }
  0xc4   : > { %599 = vst.msk [vmem:[#allocation2] sm:$0x3] %vm598_vm5, %v596_v45 }
  0xc5   : > { %1634 = vst.msk [vmem:[#allocation6] sm:$0x3] %vm1633_vm3, %v2077_v23 }
  0xc6   : > { %v604_v46 = vpop.permute.xlu0 %603  ;;  %v613_v47 = vpop.permute.xlu1 %612 }
  0xc7   : > { %607 = vst.msk [vmem:[#allocation2] sm:$0xc] %vm606_vm6, %v604_v46 }
  0xc8   : > { %615 = vst.msk [vmem:[#allocation2 + $0x4] sm:$0x3] %vm598_vm5, %v613_v47 }
  0xca   : > { %v620_v48 = vpop.permute.xlu0 %619  ;;  %v674_v49 = vpop.permute.xlu1 %673 }
  0xcb   : > { %622 = vst.msk [vmem:[#allocation2 + $0x4] sm:$0xc] %vm606_vm6, %v620_v48 }
  0xcc   : > { %677 = vst.msk [vmem:[#allocation2] sm:$0x3] %vm676_vm7, %v674_v49 }
  0xce   : > { %v681_v50 = vpop.permute.xlu0 %680  ;;  %v688_v51 = vpop.permute.xlu1 %687 }
  0xcf   : > { %684 = vst.msk [vmem:[#allocation2] sm:$0xc] %vm683_vm8, %v681_v50 }
  0xd0   : > { %690 = vst.msk [vmem:[#allocation2 + $0x4] sm:$0x3] %vm676_vm7, %v688_v51 }
  0xd2   : > { %v694_v52 = vpop.permute.xlu0 %693 }
  0xd3   : > { %696 = vst.msk [vmem:[#allocation2 + $0x4] sm:$0xc] %vm683_vm8, %v694_v52 }
  0xda   : > { %v2034_v53 = vld [vmem:[#allocation2] sm:$0xff]  }
  0xdb   : > { %1920 = vmatpush3.bf16.msra.mxu0 %v2034_v53 }
  0xdc   : > { %1937 = vmatprep.subr.bf16.mxu0 %v2077_v23 }
  0xde   : > { %1922 = vmatmul.mubr.msk.bf16.vlgmr.msra.gmra.mxu0 %vm784_vm9, %v2035_v54 }
  0xdf   : > { %1939 = vmatprep.mubr.msk.bf16.mxu0 %vm2085_vm1, %v2077_v23 }
 0x19e   : > { %v822_v56 = vpop.f32.mrf.mxu0 }
 0x19f   : > { %831 = vrot.lane.b32.xlu1 %v822_v56, %s2069_s18 }
 0x1a0   : > { %v1923_v57 = vpop.f32.mrf.mxu0 }
 0x1a2   : > { %v825_v59 = vpop.f32.mrf.mxu0 }
 0x1a3   : > { %833 = vrot.lane.b32.xlu0 %v825_v59, %s2069_s18  ;;  %853 = vperm.xlu1 %2022, %v849_v58  }
 0x1a4   : > { %v1924_v60 = vpop.f32.mrf.mxu0 }
 0x1a7   : > { %858 = vperm.xlu0 %2023, %v850_v61  }
 0x211   : > { %v832_v62 = vpop.permute.xlu1 %831 }
 0x212   : > { %v837_v63 = vmax.f32 %v822_v56, %v832_v62 }
 0x214   : > { %841 = vrot.lane.b32.xlu1 %v837_v63, %s2088_s21 }
 0x215   : > { %v834_v0 = vpop.permute.xlu0 %833 }
 0x216   : > { %v838_v1 = vmax.f32 %v825_v59, %v834_v0 }
 0x218   : > { %843 = vrot.lane.b32.xlu1 %v838_v1, %s2088_s21 }
 0x21e   : > { %v854_v2 = vpop.permute.xlu1 %853 }
 0x222   : > { %v859_v7 = vpop.permute.xlu0 %858 }
 0x286   : > { %v842_v3 = vpop.permute.xlu1 %841 }
 0x287   : > { %v847_v4 = vmax.f32 %v837_v63, %v842_v3 }
 0x289   : > { %v861_v5 = vadd.f32 %v854_v2, %v847_v4 }
 0x28a   : > { %v844_v6 = vpop.permute.xlu1 %843 }
 0x28b   : > { %v863_v8 = vmax.f32 %v861_v5, 0.0  ;;  %v848_v9 = vmax.f32 %v838_v1, %v844_v6  ;;  %v1379_v5 = vld [vmem:[%s2502_s6 + $0x8] sm:$0xff]  ;;  %v1378_v6 = vld [vmem:[%s2502_s6] sm:$0xff] }
 0x28d   : > { %866 = vst.msk [vmem:[#allocation4] sm:$0xff] %vm865_vm12, %v863_v8  ;;  %v862_v10 = vadd.f32 %v859_v7, %v848_v9  ;;  %v1885_v11 = vpack.c.bf16 %v863_v8, %v863_v8  ;;  %v2043_v9 = vld [vmem:[%s2501_s5 + $0x8] sm:$0xff]  }
 0x28f   : > { %v864_v12 = vmax.f32 %v862_v10, 0.0  ;;  %880 = vrot.lane.b32.xlu0 %v1885_v11, %s2080_s29  ;;  %v2044_v10 = vld [vmem:[%s2501_s5] sm:$0xff]  }
 0x291   : > { %867 = vst.msk [vmem:[#allocation4 + $0x8] sm:$0xff] %vm865_vm12, %v864_v12  ;;  %v1886_v13 = vpack.c.bf16 %v864_v12, %v864_v12  ;;  %v2045_v12 = vld [vmem:[%s2501_s5 + $0x10] sm:$0xff]  }
 0x293   : > { %882 = vrot.lane.b32.xlu1 %v1886_v13, %s2080_s29 }
 0x301   : > { %v881_v14 = vpop.permute.xlu0 %880 }
 0x302   : > { %887 = vst.msk [vmem:[#allocation3] sm:$0xf] %vm886_vm13, %v881_v14 }
 0x305   : > { %v883_v15 = vpop.permute.xlu1 %882 }
 0x306   : > { %888 = vst.msk [vmem:[#allocation3 + $0x4] sm:$0xf] %vm886_vm13, %v883_v15 }
 0x30d   : > { %v2036_v16 = vld [vmem:[#allocation3] sm:$0xff]  }
 0x30e   : > { %1012 = vrot.lane.b32.xlu1 %v2036_v16, %s2079_s12  ;;  %906 = vrot.lane.b32.xlu0 %v2036_v16, %s2074_s23 }
 0x312   : > { %1126 = vrot.lane.b32.xlu1 %v2036_v16, %s2069_s18  ;;  %1069 = vrot.lane.b32.xlu0 %v2036_v16, %s2071_s20 }
 0x316   : > { %1184 = vperm.xlu1 %2022, %v1176_v17   ;;  %1179 = vperm.xlu0 %2023, %v1175_v18  }
 0x380   : > { %v1013_v19 = vpop.permute.xlu1 %1012  ;;  %v907_v20 = vpop.permute.xlu0 %906 }
 0x381   : > { %1926 = vmatpush3.bf16.msra.mxu1 %v907_v20  ;;  %1938 = vmatpush3.bf16.msra.mxu0 %v1013_v19 }
 0x382   : > { %1949 = vmatprep.subr.bf16.mxu0 %v2077_v23  ;;  %1931 = vmatprep.subr.bf16.mxu1 %v2077_v23 }
 0x384   : > { %v1127_v24 = vpop.permute.xlu1 %1126  ;;  %1928 = vmatmul.mubr.msk.bf16.vlgmr.msra.gmra.mxu1 %vm909_vm14, %v2037_v21  ;;  %1940 = vmatmul.mubr.msk.bf16.vlgmr.msra.gmra.mxu0 %vm909_vm14, %v2038_v22  ;;  %v1070_v27 = vpop.permute.xlu0 %1069 }
 0x385   : > { %1932 = vmatpush3.bf16.msra.mxu1 %v2036_v16  ;;  %1950 = vmatpush3.bf16.msra.mxu0 %v1127_v24 }
 0x386   : > { %1933 = vmatprep.mubr.msk.bf16.mxu1 %vm2085_vm1, %v2077_v23  ;;  %1943 = vmatprep.subr.bf16.mxu1 %v2077_v23 }
 0x387   : > { %1951 = vmatprep.mubr.msk.bf16.mxu0 %vm2085_vm1, %v2077_v23  ;;  %1961 = vmatprep.subr.bf16.mxu0 %v2077_v23 }
 0x38c   : > { %1934 = vmatmul.mubr.msk.bf16.vlgmr.msra.gmra.mxu1 %vm909_vm14, %v2039_v25  ;;  %1952 = vmatmul.mubr.msk.bf16.vlgmr.msra.gmra.mxu0 %vm909_vm14, %v2040_v26 }
 0x38d   : > { %1944 = vmatpush3.bf16.msra.mxu1 %v1070_v27  ;;  %1945 = vmatprep.mubr.msk.bf16.mxu1 %vm2085_vm1, %v2077_v23 }
 0x38e   : > { %1955 = vmatprep.subr.bf16.mxu1 %v2077_v23  ;;  %1963 = vmatprep.mubr.msk.bf16.mxu0 %vm2085_vm1, %v2077_v23 }
 0x391   : > { %v1180_v53 = vpop.permute.xlu0 %1179  ;;  %v1185_v61 = vpop.permute.xlu1 %1184 }
 0x394   : > { %1946 = vmatmul.mubr.msk.bf16.vlgmr.msra.gmra.mxu1 %vm909_vm14, %v2041_v28 }
 0x395   : > { %1957 = vmatprep.mubr.msk.bf16.mxu1 %vm2085_vm1, %v2077_v23 }
 0x444   : > { %v947_v29 = vpop.f32.mrf.mxu1  ;;  %v1052_v30 = vpop.f32.mrf.mxu0 }
 0x446   : > { %v1929_v31 = vpop.f32.mrf.mxu1  ;;  %v1941_v32 = vpop.f32.mrf.mxu0 }
 0x448   : > { %v950_v33 = vpop.f32.mrf.mxu1  ;;  %v1055_v34 = vpop.f32.mrf.mxu0 }
 0x44a   : > { %v1930_v35 = vpop.f32.mrf.mxu1  ;;  %v1942_v36 = vpop.f32.mrf.mxu0 }
 0x44c   : > { %v997_v37 = vpop.f32.mrf.mxu1  ;;  %v1166_v38 = vpop.f32.mrf.mxu0 }
 0x44d   : > { %v998_v41 = vadd.f32 %v997_v37, %v947_v29 }
 0x44e   : > { %v1935_v39 = vpop.f32.mrf.mxu1  ;;  %v1953_v40 = vpop.f32.mrf.mxu0 }
 0x44f   : > { %v1059_v47 = vadd.f32 %v1052_v30, %v998_v41  ;;  %v1500_v40 = vld [vmem:[%s2506_s10] sm:$0xff] }
 0x450   : > { %v1000_v42 = vpop.f32.mrf.mxu1  ;;  %v1169_v43 = vpop.f32.mrf.mxu0  ;;  %v1418_v41 = vld [vmem:[%s2504_s8] sm:$0xf] }
 0x451   : > { %v1001_v46 = vadd.f32 %v1000_v42, %v950_v33  ;;  %v1501_v42 = vld [vmem:[%s2506_s10 + $0x8] sm:$0xff] }
 0x452   : > { %v1936_v44 = vpop.f32.mrf.mxu1  ;;  %v1954_v45 = vpop.f32.mrf.mxu0 }
 0x453   : > { %v1060_v52 = vadd.f32 %v1055_v34, %v1001_v46 }
 0x454   : > { %v1109_v48 = vpop.f32.mrf.mxu1 }
 0x455   : > { %v1116_v49 = vadd.f32 %v1109_v48, %v1059_v47 }
 0x456   : > { %v1947_v50 = vpop.f32.mrf.mxu1 }
 0x457   : > { %v1173_v51 = vadd.f32 %v1166_v38, %v1116_v49 }
 0x458   : > { %v1112_v54 = vpop.f32.mrf.mxu1 }
 0x459   : > { %v1187_v56 = vadd.f32 %v1180_v53, %v1173_v51  ;;  %v1117_v57 = vadd.f32 %v1112_v54, %v1060_v52  ;;  %v1415_v51 = vld [vmem:[%s2503_s7] sm:$0xf] }
 0x45a   : > { %v1948_v58 = vpop.f32.mrf.mxu1  ;;  %v1498_v52 = vld [vmem:[%s2505_s9] sm:$0xff] }
 0x45b   : > { %v1174_v59 = vadd.f32 %v1169_v43, %v1117_v57  ;;  %v1189_v60 = vmax.f32 %v1187_v56, 0.0 }
 0x45d   : > { %v1188_v62 = vadd.f32 %v1185_v61, %v1174_v59  ;;  %v1887_v63 = vpack.c.bf16 %v1189_v60, %v1189_v60  ;;  %v1499_v59 = vld [vmem:[%s2505_s9 + $0x8] sm:$0xff] }
 0x45f   : > { %1197 = vrot.lane.b32.xlu0 %v1887_v63, %s2080_s29  ;;  %v1190_v0 = vmax.f32 %v1188_v62, 0.0 }
 0x461   : > { %v1888_v1 = vpack.c.bf16 %v1190_v0, %v1190_v0 }
 0x463   : > { %1199 = vrot.lane.b32.xlu1 %v1888_v1, %s2080_s29 }
 0x4d1   : > { %v1198_v2 = vpop.permute.xlu0 %1197 }
 0x4d2   : > { %1203 = vst.msk [vmem:[#allocation3] sm:$0xf] %vm886_vm13, %v1198_v2 }
 0x4d5   : > { %v1200_v3 = vpop.permute.xlu1 %1199 }
 0x4d6   : > { %1204 = vst.msk [vmem:[#allocation3 + $0x4] sm:$0xf] %vm886_vm13, %v1200_v3 }
 0x4dd   : > { %v2042_v4 = vld [vmem:[#allocation3] sm:$0xff]  }
 0x4de   : > { %1274 = vrot.lane.b32.xlu1 %v2042_v4, %s2074_s23  ;;  %1222 = vrot.lane.b32.xlu0 %v2042_v4, %s2079_s12 }
 0x4e2   : > { %1387 = vperm.xlu1 %2022, %v1379_v5   ;;  %1329 = vrot.lane.b32.xlu0 %v2042_v4, %s2071_s20 }
 0x4e6   : > { %1382 = vperm.xlu0 %2023, %v1378_v6  }
 0x550   : > { %v1275_v7 = vpop.permute.xlu1 %1274  ;;  %v1223_v8 = vpop.permute.xlu0 %1222 }
 0x551   : > { %1956 = vmatpush3.bf16.msra.mxu1 %v1223_v8  ;;  %1962 = vmatpush3.bf16.msra.mxu0 %v1275_v7 }
 0x552   : > { %1967 = vmatprep.subr.bf16.mxu1 %v2077_v23  ;;  %1973 = vmatprep.subr.mxu0 %v2077_v23 }
 0x554   : > { %1958 = vmatmul.mubr.msk.bf16.vlgmr.msra.gmra.mxu1 %vm909_vm14, %v2043_v9  ;;  %1964 = vmatmul.mubr.msk.bf16.vlgmr.msra.gmra.mxu0 %vm909_vm14, %v2044_v10  ;;  %v1330_v11 = vpop.permute.xlu0 %1329 }
 0x555   : > { %1968 = vmatpush3.bf16.msra.mxu1 %v1330_v11  ;;  %1969 = vmatprep.mubr.msk.bf16.mxu1 %vm2085_vm1, %v2077_v23 }
 0x556   : > { %1977 = vmatprep.mubr.msk.f32.mxu0 %vm2085_vm1, %v2077_v23  ;;  %vm1518_vm1 = vcmask 1043456  }
 0x55c   : > { %1970 = vmatmul.mubr.msk.bf16.vlgmr.msra.gmra.mxu1 %vm909_vm14, %v2045_v12 }
 0x55d   : > { %v1388_v32 = vpop.permute.xlu1 %1387  ;;  %1982 = vmatprep.mubr.msk.f32.mxu1 %vm865_vm12, %v1498_v52 }
 0x561   : > { %v1383_v25 = vpop.permute.xlu0 %1382 }
 0x614   : > { %v1262_v13 = vpop.f32.mrf.mxu1  ;;  %v1314_v14 = vpop.f32.mrf.mxu0 }
 0x615   : > { %v1315_v21 = vadd.f32 %v1314_v14, %v1262_v13  ;;  %v2089_v14 = vmov 2  }
 0x616   : > { %v1959_v15 = vpop.f32.mrf.mxu1  ;;  %v1965_v16 = vpop.f32.mrf.mxu0 }
 0x617   : > { %v2090_v15 = vmov 1  }
 0x618   : > { %v1265_v17 = vpop.f32.mrf.mxu1  ;;  %v1317_v18 = vpop.f32.mrf.mxu0 }
 0x619   : > { %v1318_v27 = vadd.f32 %v1317_v18, %v1265_v17 }
 0x61a   : > { %v1960_v19 = vpop.f32.mrf.mxu1  ;;  %v1966_v20 = vpop.f32.mrf.mxu0 }
 0x61c   : > { %v1369_v22 = vpop.f32.mrf.mxu1 }
 0x61d   : > { %v1376_v24 = vadd.f32 %v1369_v22, %v1315_v21 }
 0x61e   : > { %v1971_v26 = vpop.f32.mrf.mxu1 }
 0x61f   : > { %v1390_v28 = vadd.f32 %v1383_v25, %v1376_v24 }
 0x620   : > { %v1372_v29 = vpop.f32.mrf.mxu1 }
 0x621   : > { %v2421_v30 = vmax.f32 %v1390_v28, 0.0  ;;  %v1377_v31 = vadd.f32 %v1372_v29, %v1318_v27 }
 0x622   : > { %v1972_v33 = vpop.f32.mrf.mxu1 }
 0x623   : > { %v1391_v34 = vadd.f32 %v1388_v32, %v1377_v31  ;;  %v1394_v35 = vsel %vm865_vm12, %v2421_v30, 0.0  ;;  %v1406_v39 = vsel %vm865_vm12, %v2421_v30, -inf }
 0x624   : > { %1395 = vadd.xlane.f32.xlu0 %v1394_v35 }
 0x625   : > { %v2425_v36 = vmax.f32 %v1391_v34, 0.0 }
 0x627   : > { %v1409_v37 = vsel %vm865_vm12, %v2425_v36, -inf  ;;  %v1397_v38 = vsel %vm865_vm12, %v2425_v36, 0.0 }
 0x628   : > { %1410 = vmax.xlane.f32.xlu0 %v1409_v37  ;;  %1398 = vadd.xlane.f32.xlu1 %v1397_v38 }
 0x62c   : > { %1407 = vmax.xlane.f32.xlu1 %v1406_v39  ;;  %v1666_v39 = vld [vmem:[%s2507_s11] sm:$0x3] }
 0x63d   : > { %1504 = vperm.xlu1 %2022, %v1500_v40   ;;  %v2091_v40 = vmov 3  }
 0x63e   : > { %1421 = vperm.xlu0 %2023, %v1418_v41   ;;  %v2092_v41 = vmov 4  }
 0x641   : > { %1509 = vperm.xlu1 %2022, %v1501_v42   ;;  %v2093_v42 = vmov 5  }
 0x6ad   : > { %v1396_v43 = vpop.xlane.xlu0 %1395 }
 0x6ae   : > { %v1401_v44 = vmul.f32 0.25, %v1396_v43  ;;  %v2094_v43 = vmov 6  }
 0x6b0   : > { %1404 = vst.msk [vmem:[#allocation5] sm:$0xff] %vm1403_vm15, %v1401_v44 }
 0x6b1   : > { %v1399_v45 = vpop.xlane.xlu1 %1398  ;;  %v1411_v47 = vpop.xlane.xlu0 %1410 }
 0x6b2   : > { %v1402_v46 = vmul.f32 0.25, %v1399_v45 }
 0x6b4   : > { %1405 = vst.msk [vmem:[#allocation5 + $0x8] sm:$0xff] %vm1403_vm15, %v1402_v46 }
 0x6b5   : > { %1414 = vst.msk [vmem:[#allocation5 + $0x8] sm:$0xff] %vm1412_vm0, %v1411_v47  ;;  %v1408_v48 = vpop.xlane.xlu1 %1407 }
 0x6b6   : > { %1413 = vst.msk [vmem:[#allocation5] sm:$0xff] %vm1412_vm0, %v1408_v48 }
 0x6b9   : > { %v1422_v53 = vpop.permute.xlu0 %1421  ;;  %v1505_v60 = vpop.permute.xlu1 %1504 }
 0x6bc   : > { %v1417_v49 = vld [vmem:[#allocation5 + $0x8] sm:$0xff] }
 0x6bd   : > { %1974 = vmatpush3.msra.mxu0 %v1417_v49  ;;  %v1416_v50 = vld [vmem:[#allocation5] sm:$0xff]  ;;  %v1510_v61 = vpop.permute.xlu1 %1509 }
 0x6be   : > { %1975 = vmatprep.subr.mxu0 %v2077_v23 }
 0x6bf   : > { %1976 = vmatpush3.msra.mxu0 %v1416_v50 }
 0x6c0   : > { %1978 = vmatmul.mubr.msk.f32.vlgmr.msra.gmra.mxu0 %vm909_vm14, %v1415_v51 }
 0x780   : > { %v1493_v54 = vpop.f32.mrf.mxu0 }
 0x781   : > { %v1494_v56 = vadd.f32 %v1493_v54, %v1422_v53 }
 0x782   : > { %v1979_v57 = vpop.f32.mrf.mxu0 }
 0x783   : > { %v1497_v58 = vmax.f32 %v1494_v56, 0.0 }
 0x785   : > { %1980 = vmatprep.subr.msk.mxu1 %vm1518_vm1, %v1497_v58 }
 0x786   : > { %1981 = vmatpush3.msk.msra.mxu1 %vm1518_vm1, %v1497_v58 }
 0x787   : > { %1983 = vmatmul.mubr.msk.f32.vlgmr.msra.gmra.mxu1 %vm865_vm12, %v1499_v59 }
 0x847   : > { %v1984_v62 = vpop.f32.mrf.mxu1 }
 0x848   : > { %v1594_v63 = vadd.f32 %v1984_v62, %v1510_v61 }
 0x849   : > { %v1588_v0 = vpop.f32.mrf.mxu1 }
 0x84a   : > { %v1589_v1 = vadd.f32 %v1588_v0, %v1505_v60  ;;  %1601 = vrot.lane.b32.xlu1 %v1594_v63, %s2074_s23 }
 0x84c   : > { %1599 = vrot.lane.b32.xlu0 %v1589_v1, %s2074_s23 }
 0x8bc   : > { %v1602_v2 = vpop.permute.xlu1 %1601 }
 0x8bd   : > { %v1606_v3 = vadd.f32 %v1602_v2, %v1594_v63 }
 0x8be   : > { %v1600_v4 = vpop.permute.xlu0 %1599 }
 0x8bf   : > { %v1879_v5 = vmul.f32 -1.442695, %v1606_v3  ;;  %v1605_v6 = vadd.f32 %v1600_v4, %v1589_v1 }
 0x8c1   : > { %2046 = vpow2.f32 %v1879_v5  ;;  %v1878_v7 = vmul.f32 -1.442695, %v1605_v6 }
 0x8c3   : > { %2048 = vpow2.f32 %v1878_v7 }
 0x8ce   : > { %v2047_v8 = vpop.eup %2046 }
 0x8cf   : > { %v1614_v9 = vadd.f32 1.0, %v2047_v8 }
 0x8d0   : > { %v2049_v10 = vpop.eup %2048 }
 0x8d1   : > { %2050 = vrcp.f32 %v1614_v9  ;;  %v1613_v11 = vadd.f32 1.0, %v2049_v10 }
 0x8d3   : > { %2052 = vrcp.f32 %v1613_v11 }
 0x8de   : > { %v2051_v12 = vpop.eup %2050 }
 0x8df   : > { %1626 = vperm.xlu1 %2022, %v2051_v12  }
 0x8e0   : > { %v2053_v13 = vpop.eup %2052 }
 0x8e1   : > { %1621 = vperm.xlu0 %2023, %v2053_v13  }
 0x8e3   : > { %2025 = vset.pattern.permute.xlu1 %v2089_v14 }
 0x8e5   : > { %2024 = vset.pattern.permute.xlu0 %v2090_v15 }
 0x95a   : > { %v1627_v16 = vpop.permute.xlu1 %1626 }
 0x95b   : > { %v2460_v17 = vmul.f32 %v1627_v16, %v2425_v36  ;;  %v1747_v16 = vlaneseq }
 0x95c   : > { %v1622_v18 = vpop.permute.xlu0 %1621 }
 0x95d   : > { %v2463_v19 = vmul.f32 %v1622_v18, %v2421_v30  ;;  %v1636_v20 = vsel %vm865_vm12, %v2460_v17, 0.0  ;;  %v1653_v21 = vsel %vm865_vm12, %v2460_v17, -inf  ;;  %v1748_v18 = vshrl.u32 %v1747_v16, 7 }
 0x95f   : > { %v1635_v22 = vsel %vm865_vm12, %v2463_v19, 0.0  ;;  %v1652_v23 = vsel %vm865_vm12, %v2463_v19, -inf }
 0x960   : > { %v1637_v24 = vadd.f32 %v1636_v20, %v1635_v22  ;;  %v1654_v25 = vmax.f32 %v1652_v23, %v1653_v21  ;;  %v1749_v20 = vsub.s32 0, %v1748_v18 }
 0x962   : > { %v1638_v26 = vrot.slane %v1637_v24, 4  ;;  %v1655_v27 = vrot.slane %v1654_v25, 4 }
 0x964   : > { %v1639_v28 = vadd.f32 %v1638_v26, %v1637_v24  ;;  %v1656_v29 = vmax.f32 %v1654_v25, %v1655_v27  ;;  %v1753_v25 = vld [vmem:[#allocation4] sm:$0xff]  ;;  %v1754_v26 = vld [vmem:[#allocation4 + $0x8] sm:$0xff] }
 0x966   : > { %v1657_v30 = vrot.slane %v1656_v29, 2  ;;  %v1640_v31 = vrot.slane %v1639_v28, 2 }
 0x968   : > { %v1658_v32 = vmax.f32 %v1656_v29, %v1657_v30  ;;  %v1641_v33 = vadd.f32 %v1640_v31, %v1639_v28 }
 0x96a   : > { %v1659_v34 = vrot.slane %v1658_v32, 1  ;;  %v1642_v35 = vrot.slane %v1641_v33, 1 }
 0x96c   : > { %v1660_v36 = vmax.f32 %v1658_v32, %v1659_v34  ;;  %v1643_v37 = vadd.f32 %v1642_v35, %v1641_v33 }
 0x96e   : > { %1662 = vrot.lane.b32.xlu1 %v1660_v36, %s2073_s22  ;;  %v1645_v38 = vmul.f32 0.0625, %v1643_v37 }
 0x970   : > { %1647 = vrot.lane.b32.xlu0 %v1645_v38, %s2073_s22 }
 0x972   : > { %1685 = vperm.xlu1 %2025, %v1666_v39  }
 0x974   : > { %1675 = vperm.xlu0 %2024, %v1666_v39  }
 0x976   : > { %2026 = vset.pattern.permute.xlu1 %v2091_v40 }
 0x977   : > { %1695 = vperm.xlu1 %2026, %v1666_v39  }
 0x978   : > { %2027 = vset.pattern.permute.xlu0 %v2092_v41 }
 0x979   : > { %1705 = vperm.xlu0 %2027, %v1666_v39  }
 0x97b   : > { %2028 = vset.pattern.permute.xlu1 %v2093_v42 }
 0x97c   : > { %1715 = vperm.xlu1 %2028, %v1666_v39  }
 0x97d   : > { %2030 = vset.pattern.permute.xlu0 %v2087_v55 }
 0x97e   : > { %1670 = vperm.xlu0 %2030, %v1666_v39  }
 0x980   : > { %2029 = vset.pattern.permute.xlu1 %v2094_v43 }
 0x981   : > { %1725 = vperm.xlu1 %2029, %v1666_v39  }
 0x982   : > { %2031 = vset.pattern.permute.xlu0 %v2094_v43 }
 0x9e0   : > { %v1663_v44 = vpop.permute.xlu1 %1662 }
 0x9e1   : > { %1665 = vst.msk [vmem:[#allocation6 + $0x1] sm:$0x1] %vm1650_vm4, %v1663_v44 }
 0x9e2   : > { %v1648_v45 = vpop.permute.xlu0 %1647 }
 0x9e3   : > { %1651 = vst.msk [vmem:[#allocation6] sm:$0x1] %vm1650_vm4, %v1648_v45 }
 0x9ea   : > { %v1667_v47 = vld [vmem:[#allocation6] sm:$0x3] }
 0x9ed   : > { %v1686_v46 = vpop.permute.xlu1 %1685 }
 0x9ee   : > { %v1688_v52 = vmul.f32 %v1686_v46, %v1667_v47 }
 0x9ef   : > { %v1676_v48 = vpop.permute.xlu0 %1675 }
 0x9f0   : > { %v1678_v49 = vmul.f32 %v1676_v48, %v1667_v47 }
 0x9f2   : > { %v1696_v50 = vpop.permute.xlu1 %1695  ;;  %1680 = vrot.lane.b32.xlu1 %v1678_v49, %s2074_s23 }
 0x9f3   : > { %v1698_v51 = vmul.f32 %v1696_v50, %v1667_v47 }
 0x9f4   : > { %v1706_v55 = vpop.permute.xlu0 %1705 }
 0x9f5   : > { %1700 = vrot.lane.b32.xlu0 %v1698_v51, %s2071_s20  ;;  %v1708_v54 = vmul.f32 %v1706_v55, %v1667_v47  ;;  %s1738_s20 = sld [smem:[#allocation7]] }
 0x9f6   : > { %1690 = vrot.lane.b32.xlu1 %v1688_v52, %s2079_s12 }
 0x9f7   : > { %v1716_v53 = vpop.permute.xlu1 %1715 }
 0x9f8   : > { %v1718_v56 = vmul.f32 %v1716_v53, %v1667_v47 }
 0x9f9   : > { %v1671_v59 = vpop.permute.xlu0 %1670 }
 0x9fa   : > { %1720 = vrot.lane.b32.xlu0 %v1718_v56, %s2066_s15  ;;  %1710 = vrot.lane.b32.xlu1 %v1708_v54, %s2069_s18  ;;  %v1673_v61 = vmul.f32 %v1671_v59, %v1667_v47  ;;  %s1884_s15 = sshll.u32 %s2511_s28, 4 }
 0x9fb   : > { %v1739_v10 = vstv %s1738_s20  ;;  %s441_s23 = scalar_lea.vmem %s2509_s13, %s1884_s15 }
 0x9fc   : > { %v1726_v57 = vpop.permute.xlu1 %1725 }
 0x9fd   : > { %v1728_v58 = vmul.f32 %v1726_v57, %v1667_v47 }
 0x9ff   : > { %1730 = vrot.lane.b32.xlu1 %v1728_v58, %s2078_s26 }
 0xa64   : > { %v1681_v60 = vpop.permute.xlu1 %1680 }
 0xa65   : > { %v1683_v62 = vadd.f32 %v1681_v60, %v1673_v61 }
 0xa67   : > { %v1701_v63 = vpop.permute.xlu0 %1700 }
 0xa68   : > { %v1691_v0 = vpop.permute.xlu1 %1690 }
 0xa69   : > { %v1693_v1 = vadd.f32 %v1691_v0, %v1683_v62 }
 0xa6b   : > { %v1703_v2 = vadd.f32 %v1701_v63, %v1693_v1 }
 0xa6c   : > { %v1711_v3 = vpop.permute.xlu1 %1710  ;;  %v1721_v5 = vpop.permute.xlu0 %1720 }
 0xa6d   : > { %v1713_v4 = vadd.f32 %v1711_v3, %v1703_v2 }
 0xa6f   : > { %v1723_v6 = vadd.f32 %v1721_v5, %v1713_v4 }
 0xa71   : > { %v1731_v7 = vpop.permute.xlu1 %1730 }
 0xa72   : > { %v1733_v8 = vadd.f32 %v1731_v7, %v1723_v6 }
 0xa74   : > { %v1735_v9 = vrot.slane %v1733_v8, 1 }
 0xa76   : > { %v1737_v11 = vadd.f32 %v1735_v9, %v1733_v8 }
 0xa78   : > { %v1740_v12 = vadd.f32 %v1739_v10, %v1737_v11 }
 0xa7a   : > { %v1880_v13 = vmul.f32 -1.442695, %v1740_v12 }
 0xa7c   : > { %2054 = vpow2.f32 %v1880_v13 }
 0xa89   : > { %v2055_v14 = vpop.eup %2054 }
 0xa8a   : > { %v1744_v15 = vadd.f32 1.0, %v2055_v14 }
 0xa8c   : > { %2056 = vrcp.f32 %v1744_v15 }
 0xa99   : > { %v2057_v21 = vpop.eup %2056 }
 0xa9a   : > { %v1750_v22 = vrot.slane %v2057_v21, %v1749_v20 }
 0xa9c   : > { %v1751_v23 = vmul.f32 %v1750_v22, %v2463_v19  ;;  %v1752_v24 = vmul.f32 %v1750_v22, %v2460_v17 }
 0xa9e   : > { %v1755_v27 = vadd.f32 %v1753_v25, %v1751_v23  ;;  %v1756_v28 = vadd.f32 %v1754_v26, %v1752_v24 }
 0xaa0   : > { %1757 = vst.msk [vmem:[%s441_s23] sm:$0xff] %vm865_vm12, %v1755_v27  ;;  %1758 = vst.msk [vmem:[%s441_s23 + $0x8] sm:$0xff] %vm865_vm12, %v1756_v28 }
 0xaa1 PF: > { %s24_s27 = sadd.s32 1, %s2064_s27  }
 0xaa2   : > { %p21_p4 = scmp.ge.s32.totalorder %s24_s27, 4  }
 0xaa4   :  { %23 = sbr.rel (!%p21_p4) target bundleno = 2 (0x2), region = 108 }

</bundles_post_ra>
